<compile_context>
chip_gen: v5e
topology: v5e:2x2
jax: 0.10.0
libtpu: 0.0.40
codegen_flags: <defaults>
</compile_context>

<pallas_src>
import jax
import jax.numpy as jnp
from jax.experimental import pallas as pl
from jax.experimental.pallas import tpu as pltpu


# --------------------------------------------------------------------------
# Kernels
# --------------------------------------------------------------------------
def _kernel_accum_in_out(x_mm_ref, w_ref, b_ref, x_res_ref, o_ref):
    """f32-output path: accumulate directly into the resident output tile."""
    k = pl.program_id(2)

    @pl.when(k == 0)
    def _init():
        # Residual + bias folded into the accumulator init: no zero-fill and
        # no epilogue work beyond the automatic writeback.
        o_ref[...] = (x_res_ref[...].astype(jnp.float32)
                      + b_ref[...].astype(jnp.float32))

    # bf16 x bf16 -> f32 MXU matmul, accumulated into the resident out tile.
    o_ref[...] += jnp.dot(x_mm_ref[...], w_ref[...],
                          preferred_element_type=jnp.float32)


def _kernel_scratch_acc(x_mm_ref, w_ref, b_ref, x_res_ref, o_ref, acc_ref):
    """Narrow-output path: f32 VMEM scratch accumulator, cast-only epilogue."""
    k = pl.program_id(2)

    @pl.when(k == 0)
    def _init():
        acc_ref[...] = (x_res_ref[...].astype(jnp.float32)
                        + b_ref[...].astype(jnp.float32))

    acc_ref[...] += jnp.dot(x_mm_ref[...], w_ref[...],
                            preferred_element_type=jnp.float32)

    @pl.when(k == pl.num_programs(2) - 1)
    def _epilogue():
        o_ref[...] = acc_ref[...].astype(o_ref.dtype)


# --------------------------------------------------------------------------
# Generation-aware configuration
# --------------------------------------------------------------------------
def _tpu_vmem_capacity_bytes():
    try:
        return int(pltpu.get_tpu_info().vmem_capacity_bytes)
    except Exception:
        return 64 * 1024 * 1024  # conservative (v7x-class) fallback


def _pick_tile(dim, target, granules):
    """Largest tile <= target that divides dim and is a multiple of a granule
    (preferring larger granules); falls back to the full dimension (always a
    legal block per the (8,128) rule)."""
    target = min(target, dim)
    for g in granules:
        t = (target // g) * g
        while t >= g:
            if dim % t == 0:
                return t
            t -= g
    return dim


def _select_tiles(B, H, vmem_limit, in_bytes, res_bytes, out_bytes):
    # Larger tm on big-VMEM chips -> fewer re-reads of the full weight matrix.
    tm_target = 2048 if vmem_limit >= 64 * 1024 * 1024 else 1024
    tn_target = 1024
    tk_target = 1024

    tm = _pick_tile(B, tm_target, granules=(256, 128, 8))
    tn = _pick_tile(H, tn_target, granules=(256, 128))
    tk = _pick_tile(H, tk_target, granules=(256, 128))

    def vmem_est(tm_, tn_, tk_):
        mm = 2 * (tm_ * tk_ + tk_ * tn_) * in_bytes      # bf16 MXU streams (2-buf)
        res = 2 * tm_ * tn_ * res_bytes + 2 * tn_ * 4    # residual x tile + bias
        out = 2 * tm_ * tn_ * out_bytes                  # output / accumulator tile
        return mm + res + out

    # Shrink tm until the double-buffered working set fits the VMEM budget.
    while vmem_est(tm, tn, tk) > int(0.85 * vmem_limit) and tm > 256:
        new_tm = _pick_tile(B, tm // 2, granules=(256, 128, 8))
        if new_tm >= tm:
            break
        tm = new_tm

    # Keep both v7x TensorCores busy: the two "parallel" axes should together
    # have >= 2 grid iterations.
    if (B // tm) * (H // tn) < 2:
        if tm // 2 >= 8 and tm % 2 == 0 and B % (tm // 2) == 0 and (tm // 2) % 8 == 0:
            tm //= 2
        elif tn // 2 >= 128 and H % (tn // 2) == 0 and (tn // 2) % 128 == 0:
            tn //= 2

    return tm, tn, tk


# --------------------------------------------------------------------------
# Wrapper
# --------------------------------------------------------------------------
def residual_linear(x, w_t, b, *, tiles=None, mxu_dtype=jnp.bfloat16):
    """y = x + (x @ w_t + b).

    x:   (B, H)
    w_t: (H, H)  Linear weight already in (in, out) layout; ideally stored in
         bf16 at model-init time so no per-call cast is needed.
    b:   (H,) or (1, H)
    """
    B, H = x.shape
    assert w_t.shape == (H, H), "wrapped module is Linear(hidden, hidden)"
    b2d = b.reshape(1, H).astype(jnp.float32)

    out_dtype = x.dtype
    in_bytes = jnp.dtype(mxu_dtype).itemsize
    res_bytes = jnp.dtype(x.dtype).itemsize
    out_bytes = jnp.dtype(out_dtype).itemsize

    vmem_cap = _tpu_vmem_capacity_bytes()
    # v5e/v6e: 128 MiB physical VMEM -> 80 MiB budget; v7x: 64 MiB/TC -> 44 MiB.
    vmem_limit = (80 * 1024 * 1024 if vmem_cap >= 96 * 1024 * 1024
                  else 44 * 1024 * 1024)

    if tiles is None:
        tm, tn, tk = _select_tiles(B, H, vmem_limit, in_bytes, res_bytes, out_bytes)
    else:
        tm, tn, tk = tiles

    # TODO(synk): shapes not divisible by the chosen tiles need wrapper-side
    # padding; out of scope here.
    assert B % tm == 0 and H % tn == 0 and H % tk == 0, (
        "shapes must be divisible by the chosen tile sizes")

    # bf16 MXU operands (no-op casts if already bf16).  The residual stream
    # `x` stays in its original dtype for an exact f32 residual add.
    x_mm = x.astype(mxu_dtype)
    w_mm = w_t.astype(mxu_dtype)

    grid = (B // tm, H // tn, H // tk)

    in_specs = [
        pl.BlockSpec((tm, tk), lambda i, j, k: (i, k)),   # x tile (bf16) for MXU
        pl.BlockSpec((tk, tn), lambda i, j, k: (k, j)),   # W^T tile (bf16)
        pl.BlockSpec((1, tn), lambda i, j, k: (0, j)),    # bias tile (f32)
        pl.BlockSpec((tm, tn), lambda i, j, k: (i, j)),   # x tile (orig) residual
    ]
    out_spec = pl.BlockSpec((tm, tn), lambda i, j, k: (i, j))

    if jnp.dtype(out_dtype) == jnp.dtype(jnp.float32):
        kernel = _kernel_accum_in_out
        scratch = []                                      # accumulate in o_ref
    else:
        kernel = _kernel_scratch_acc
        scratch = [pltpu.VMEM((tm, tn), jnp.float32)]     # f32 accumulator

    return pl.pallas_call(
        kernel,
        out_shape=jax.ShapeDtypeStruct((B, H), out_dtype),
        grid_spec=pltpu.PrefetchScalarGridSpec(
            num_scalar_prefetch=0,
            grid=grid,
            in_specs=in_specs,
            out_specs=out_spec,
            scratch_shapes=scratch,
        ),
        compiler_params=pltpu.CompilerParams(
            dimension_semantics=("parallel", "parallel", "arbitrary"),
            vmem_limit_bytes=vmem_limit,
        ),
    )(x_mm, w_mm, b2d, x)


# --------------------------------------------------------------------------
# Demo / correctness check
# --------------------------------------------------------------------------
if __name__ == "__main__":
    key = jax.random.PRNGKey(0)
    kx, kw, kb = jax.random.split(key, 3)

    batch, hidden = 256, 512
    x = jax.random.normal(kx, (batch, hidden), dtype=jnp.float32)

    # Deterministic parameter init (mimics torch.nn.Linear uniform range),
    # weight stored directly in (in, out) layout.
    bound = 1.0 / (hidden ** 0.5)
    w_t = jax.random.uniform(kw, (hidden, hidden), jnp.float32, -bound, bound)
    b = jax.random.uniform(kb, (hidden,), jnp.float32, -bound, bound)

    # "Model init": store the weight in bf16 once, so the kernel streams bf16
    # MXU operands with no per-call / per-step casts on the weight.
    w_t_bf16 = w_t.astype(jnp.bfloat16)

    out = residual_linear(x, w_t_bf16, b)
    out = jax.block_until_ready(out)

    # Matched-precision reference (bf16 MXU operands, f32 accumulation).
    ref = x + (jnp.dot(x.astype(jnp.bfloat16), w_t_bf16,
                       preferred_element_type=jnp.float32) + b)
    assert jnp.allclose(out, ref, atol=1e-4, rtol=1e-4), \
        "mismatch vs matched-precision reference"

    # Loose sanity check against the exact-f32 semantics of the PyTorch module
    # (difference is only bf16 MXU operand rounding).
    ref_f32 = x + (x @ w_t + b)
    assert jnp.allclose(out, ref_f32, atol=1e-1), "mismatch vs f32 reference"

    print("KERNEL_OK")
</pallas_src>

<mosaic_0001>
module attributes {stable_mosaic.version = 11 : i64} {
  func.func @_kernel_accum_in_out(%arg0: i32, %arg1: i32, %arg2: i32, %arg3: memref<128x512xbf16, #tpu.memory_space<vmem>>, %arg4: memref<512x512xbf16, #tpu.memory_space<vmem>>, %arg5: memref<1x512xf32, #tpu.memory_space<vmem>>, %arg6: memref<128x512xf32, #tpu.memory_space<vmem>>, %arg7: memref<128x512xf32, #tpu.memory_space<vmem>>) attributes {dimension_semantics = [#tpu.dimension_semantics<parallel>, #tpu.dimension_semantics<parallel>, #tpu.dimension_semantics<arbitrary>], iteration_bounds = array<i64: 2, 1, 1>, scalar_prefetch = 0 : i64, scratch_operands = 0 : i64, tpu.core_type = #tpu.core_type<tc>, window_params = [{transform_indices = @transform_0, window_bounds = array<i64: 128, 512>}, {transform_indices = @transform_1, window_bounds = array<i64: 512, 512>}, {transform_indices = @transform_2, window_bounds = array<i64: 1, 512>}, {transform_indices = @transform_3, window_bounds = array<i64: 128, 512>}, {transform_indices = @transform_4, window_bounds = array<i64: 128, 512>}]} {
    %c0_i32 = arith.constant 0 : i32
    %0 = arith.cmpi eq, %arg2, %c0_i32 : i32
    %1 = arith.extui %0 : i1 to i32
    %c0_i32_0 = arith.constant 0 : i32
    %2 = arith.cmpi ne, %1, %c0_i32_0 : i32
    scf.if %2 {
      %c0_8 = arith.constant 0 : index
      %c0_9 = arith.constant 0 : index
      %9 = vector.load %arg6[%c0_8, %c0_9] : memref<128x512xf32, #tpu.memory_space<vmem>>, vector<128x512xf32>
      %c0_10 = arith.constant 0 : index
      %c0_11 = arith.constant 0 : index
      %10 = vector.load %arg5[%c0_10, %c0_11] : memref<1x512xf32, #tpu.memory_space<vmem>>, vector<1x512xf32>
      %11 = vector.broadcast %10 : vector<1x512xf32> to vector<128x512xf32>
      %12 = arith.addf %9, %11 : vector<128x512xf32>
      %c0_12 = arith.constant 0 : index
      %c0_13 = arith.constant 0 : index
      %13 = vector.load %arg7[%c0_12, %c0_13] : memref<128x512xf32, #tpu.memory_space<vmem>>, vector<128x512xf32>
      tpu.vector_store %arg7[%c0_12, %c0_13], %12 {strides = array<i32>} : memref<128x512xf32, #tpu.memory_space<vmem>>, vector<128x512xf32>,
    } else {
    }
    %c0 = arith.constant 0 : index
    %c0_1 = arith.constant 0 : index
    %3 = vector.load %arg7[%c0, %c0_1] : memref<128x512xf32, #tpu.memory_space<vmem>>, vector<128x512xf32>
    %c0_2 = arith.constant 0 : index
    %c0_3 = arith.constant 0 : index
    %4 = vector.load %arg3[%c0_2, %c0_3] : memref<128x512xbf16, #tpu.memory_space<vmem>>, vector<128x512xbf16>
    %c0_4 = arith.constant 0 : index
    %c0_5 = arith.constant 0 : index
    %5 = vector.load %arg4[%c0_4, %c0_5] : memref<512x512xbf16, #tpu.memory_space<vmem>>, vector<512x512xbf16>
    %cst = arith.constant dense<0.000000e+00> : vector<128x512xf32>
    %6 = tpu.matmul %4, %5, %cst {dimension_numbers = #tpu.dot_dimension_numbers<[1], [0], [0], [1], [0, 0, 1, 1], [], []>} : vector<128x512xbf16>, vector<512x512xbf16>, vector<128x512xf32> -> vector<128x512xf32>
    %7 = arith.addf %3, %6 : vector<128x512xf32>
    %c0_6 = arith.constant 0 : index
    %c0_7 = arith.constant 0 : index
    %8 = vector.load %arg7[%c0_6, %c0_7] : memref<128x512xf32, #tpu.memory_space<vmem>>, vector<128x512xf32>
    tpu.vector_store %arg7[%c0_6, %c0_7], %7 {strides = array<i32>} : memref<128x512xf32, #tpu.memory_space<vmem>>, vector<128x512xf32>,
    return
  }
  func.func @transform_0(%arg0: i32, %arg1: i32, %arg2: i32) -> (i32, i32) {
    %c0_i32 = arith.constant 0 : i32
    return %arg0, %arg2 : i32, i32
  }
  func.func @transform_1(%arg0: i32, %arg1: i32, %arg2: i32) -> (i32, i32) {
    %c0_i32 = arith.constant 0 : i32
    return %arg2, %arg1 : i32, i32
  }
  func.func @transform_2(%arg0: i32, %arg1: i32, %arg2: i32) -> (i32, i32) {
    %c0_i32 = arith.constant 0 : i32
    %c0_i32_0 = arith.constant 0 : i32
    return %c0_i32, %arg1 : i32, i32
  }
  func.func @transform_3(%arg0: i32, %arg1: i32, %arg2: i32) -> (i32, i32) {
    %c0_i32 = arith.constant 0 : i32
    return %arg0, %arg1 : i32, i32
  }
  func.func @transform_4(%arg0: i32, %arg1: i32, %arg2: i32) -> (i32, i32) {
    %c0_i32 = arith.constant 0 : i32
    return %arg0, %arg1 : i32, i32
  }
}

</mosaic_0001>

<bundles_post_ra>
// kernel: tpu_custom_call.1
= control target key start
LH: loop header
LB: loop body
LE: loop exit
PB: predicated region body
PF: predicated region fallthrough
CT: control target
= control target key end

     0   :  { %s4485_s0 = inlined_call_operand.hbm [shape: bf16[256,512], index: 0, kind: input, shape index: {}]   ;;  %s4486_s1 = inlined_call_operand.hbm [shape: bf16[512,512], index: 1, kind: input, shape index: {}]   ;;  %s4487_s2 = inlined_call_operand.hbm [shape: f32[1,512], index: 2, kind: input, shape index: {}]   ;;  %s4488_s3 = inlined_call_operand.hbm [shape: f32[256,512], index: 3, kind: input, shape index: {}]   ;;  %s4489_s4 = inlined_call_operand.hbm [shape: f32[256,512], index: 4, kind: output, shape index: {}]  }
   0x1   :  { %4493 = sst [smem:[#allocation17_spill]] %s4485_s0 }
   0x2   :  { %4494 = sst [smem:[#allocation18_spill]] %s4486_s1 }
   0x3   :  { %4495 = sst [smem:[#allocation19_spill]] %s4487_s2 }
   0x4   :  { %9 = vsyncpa [#allocation3], 0 }
   0x5   :  { %11 = vsyncpa [#allocation3 + $0x1], 0 }
   0x6   :  { %12 = vsyncpa [#allocation6], 0 }
   0x7   :  { %13 = vsyncpa [#allocation9], 0 }
   0x8   :  { %15 = vsyncpa [#allocation9 + $0x1], 0 }
   0x9   :  { %16 = vsyncpa [#allocation4], 0 }
   0xa   :  { %18 = vsyncpa [#allocation4 + $0x1], 0  ;;  %s3826_s15 = smov 0   ;;  %s3828_s16 = smov 0  }
   0xb   :  { %s3830_s17 = smov 0   ;;  %s3832_s18 = smov 0  }
   0xc   :  { %s3834_s19 = smov 0   ;;  %s3836_s20 = smov 0  }
   0xd LB: > { %s2654_s21 = sadd.s32 4294967295, %s3791_s20   ;;  %s2655_s22 = sadd.s32 4294967294, %s3791_s20   ;;  %s3791_s20 = sphi %s3836_s20, %s24_s20   ;;  %s3787_s19 = sphi %s3834_s19, %s4517_s19   ;;  %s3783_s18 = sphi %s3832_s18, %s4516_s18   ;;  %s3779_s17 = sphi %s3830_s17, %s4515_s17   ;;  %s3775_s16 = sphi %s3828_s16, %s4514_s16   ;;  %s3771_s15 = sphi %s3826_s15, %s4513_s15  }
   0xe   : > { %p65_p0 = scmp.ne.s32.totalorder %s3775_s16, %s3771_s15  ;;  %p3860_p1 = scmp.eq.s32.totalorder %s2654_s21, 0 }
   0xf   : > { %p3864_p2 = scmp.eq.s32.totalorder %s2654_s21, 1  ;;  %p179_p3 = scmp.eq.s32.totalorder %s2655_s22, 1 }
  0x10   : > { %p3870_p4 = por %p3860_p1, %p65_p0  ;;  %p2656_p5 = scmp.ge.s32.totalorder %s3791_s20, 1 }
  0x11   : > { %p3875_p6 = por %p179_p3, %p65_p0  ;;  %p186_p7 = scmp.lt.s32.totalorder %s3791_s20, 3 }
  0x12   : > { %s4500_s1 = sld [smem:[#allocation18_spill]]  ;;  %s3793_s5 = smov [#allocation5]  }
  0x13   : > { %p3883_p8 = pnand %p2656_p5, %p186_p7  ;;  %s205_s6 = sshll.u32 %s3793_s5, 4  ;;  %s206_s6 = int_to_ptr.vmem [resolvable:$true] %s205_s6 }
  0x14   : > { %p2659_p11 = scmp.ge.s32.totalorder %s3791_s20, 2  ;;  %s4502_s2 = sld [smem:[#allocation19_spill]] }
  0x15   : > { %p3500_p9 = pneg %p3883_p8  ;;  %s4490_s10 = smov 256  }
  0x16   : > { %s4491_s11 = smov 16   ;;  %s3796_s12 = smov [#allocation7]  }
  0x17   : > { %p3501_p10 = pnand %p3500_p9, %p3860_p1  ;;  %s222_s13 = sshll.u32 %s3796_s12, 4  ;;  %s223_s13 = int_to_ptr.vmem [resolvable:$true] %s222_s13 }
  0x18   : > { %s203_s29 = sshll.u32 %s4500_s1, 4  ;;  %s43_s14 = sadd.s32 1, %s3787_s19  ;;  %s204_s29 = int_to_ptr.hbm [resolvable:$true] %s203_s29 }
  0x19   : > { %3503 = dma.hbm_to_vmem [thread:$0]  (!%p3501_p10), %s204_s29, 16384, %s206_s6, [#allocation6], %s4490_s10, %s4490_s10, %s4491_s11  }
  0x1a   : > { %s220_s9 = sshll.u32 %s4502_s2, 4  ;;  %s52_s21 = sadd.s32 1, %s3779_s17  ;;  %s221_s9 = int_to_ptr.hbm [resolvable:$true] %s220_s9 }
  0x1b   : > { %3506 = dma.hbm_to_vmem [thread:$0]  (!%p3501_p10), %s221_s9, 64, %s223_s13, [#allocation6]  }
  0x1c   : > { %p45_p12 = scmp.ge.s32.totalorder %s43_s14, 2  ;;  %p59_p13 = scmp.ne.s32.totalorder %s3779_s17, %s3775_s16 }
  0x1d   : > { %p60_p0 = scmp.eq.s32.totalorder %s3791_s20, 0  ;;  %p3520_p3 = scmp.lt.s32.totalorder %s3791_s20, 2 }
  0x1e   : > { %s4519_s14 = smov (%p45_p12, %s43_s14), 0  ;;  %p3912_p7 = por %p3864_p2, %p59_p13 }
  0x1f   : > { %4503 = sst [smem:[#allocation15_spill]] %s4519_s14  ;;  %p3906_p5 = por %p60_p0, %p59_p13 }
  0x20   : > { %s47_s28 = ssub.s32 %s3787_s19, %s4519_s14  ;;  %s3919_s29 = sand.u32 1, %s3779_s17  }
  0x21   : > { %p50_p9 = scmp.eq.s32.totalorder %s47_s28, 0  ;;  %s2660_s5 = sshll.u32 %s3919_s29, 8 }
  0x22   : > { %s3321_s6 = sshll.u32 %s3787_s19, 8  ;;  %s4507_s0 = sld [smem:[#allocation17_spill]] }
  0x23   : > { %s3924_s7 = scalar_select %p50_p9, %s3779_s17, %s52_s21  }
  0x24   : > { %s237_s13 = scalar_lea.vmem [#allocation2], %s2660_s5  ;;  %p3933_p2 = pnand %p3520_p3, %p3906_p5 }
  0x25   : > { %4506 = sst [smem:[#allocation16_spill]] %s3924_s7  ;;  %s248_s10 = sshll.u32 %s237_s13, 4  ;;  %s249_s10 = int_to_ptr.vmem [resolvable:$true] %s248_s10 }
  0x26   : > { %s2664_s21 = sshll.u32 %s3919_s29, 9  ;;  %s3323_s28 = sshll.u32 %s3787_s19, 9 }
  0x27   : > { %s234_s1 = scalar_lea.sflag [#allocation3], %s3919_s29  ;;  %s4509_s8 = smov 16  }
  0x28   : > { %s245_s24 = scalar_lea.hbm %s4507_s0, %s3321_s6  ;;  %s4510_s6 = smov 256  }
  0x29   : > { %s246_s12 = sshll.u32 %s245_s24, 4  ;;  %s270_s24 = scalar_lea.hbm %s4488_s3, %s3323_s28  ;;  %s247_s12 = int_to_ptr.hbm [resolvable:$true] %s246_s12 }
  0x2a   : > { %3510 = dma.hbm_to_vmem [thread:$0]  (!%p3933_p2), %s247_s12, 4096, %s249_s10, %s234_s1, %s4510_s6, %s4510_s6, %s4509_s8  }
  0x2b   : > { %s262_s22 = scalar_lea.vmem [#allocation8], %s2664_s21  ;;  %s271_s0 = sshll.u32 %s270_s24, 4  ;;  %s272_s0 = int_to_ptr.hbm [resolvable:$true] %s271_s0 }
  0x2c   : > { %s273_s13 = sshll.u32 %s262_s22, 4  ;;  %s259_s2 = scalar_lea.sflag [#allocation9], %s3919_s29  ;;  %s274_s13 = int_to_ptr.vmem [resolvable:$true] %s273_s13 }
  0x2d   : > { %s3797_s14 = smov 512   ;;  %s3798_s7 = smov 32  }
  0x2e   : > { %3513 = dma.hbm_to_vmem [thread:$0]  (!%p3933_p2), %s272_s0, 8192, %s274_s13, %s259_s2, %s3797_s14, %s3797_s14, %s3798_s7  }
  0x2f   : > { %285 = sbr.rel (%p3883_p8) target bundleno = 740 (0x2e4), region = 36  ;;  %s3954_s1 = sand.u32 (!%p3883_p8), 1, %s3775_s16  }
  0x30   : > { %s2669_s10 = sshll.u32 (!%p3883_p8), %s3954_s1, 8  ;;  %s288_s12 = scalar_lea.sflag (!%p3883_p8), [#allocation3], %s3954_s1 }
  0x31   : > { %s3958_s21 = scalar_lea.vmem (!%p3883_p8), [#allocation2], %s2669_s10 }
  0x34   : > { %3754 = dma.done.wait (%p3870_p4), %s288_s12, 4096  }
  0x35   : > { %3756 = vsyncadd (%p3870_p4), %s288_s12, 4294963200 }
  0x36   : > { %3758 = dma.done.wait (%p3860_p1), [#allocation6], 16448  }
  0x37   : > { %3760 = vsyncadd (%p3860_p1), [#allocation6], 4294950848  ;;  %s2672_s0 = sshll.u32 %s3954_s1, 9  ;;  %s308_s2 = scalar_lea.sflag [#allocation9], %s3954_s1 }
  0x38   : > { %s3972_s30 = scalar_lea.vmem [#allocation8], %s2672_s0 }
  0x39   : > { %3762 = dma.done.wait (%p3870_p4), %s308_s2, 8192  }
  0x3a   : > { %3764 = vsyncadd (%p3870_p4), %s308_s2, 4294959104  ;;  %v2916_v0 = vld [vmem:[#allocation5 + $0xe0] sm:$0xf]  ;;  %v3386_v1 = vld [vmem:[#allocation5 + $0xec] sm:$0xf0]  ;;  %s4152_s23 = scalar_lea.vmem [#allocation10], %s2672_s0 }
  0x3b   : > { %v3044_v2 = vld [vmem:[#allocation5 + $0x1e0] sm:$0xf]  ;;  %v2917_v3 = vor.u32 %v3386_v1, %v2916_v0  ;;  %v3418_v4 = vld [vmem:[#allocation5 + $0x1ec] sm:$0xf0]  ;;  %s3485_s25 = sshll.u32 %s3783_s18, 9  ;;  %s2509_s7 = sshll.u32 %s4152_s23, 4  ;;  %s2510_s7 = int_to_ptr.vmem [resolvable:$true] %s2509_s7 }
  0x3c   : > { %v3172_v5 = vld [vmem:[#allocation5 + $0x2e0] sm:$0xf]  ;;  %v3450_v6 = vld [vmem:[#allocation5 + $0x2ec] sm:$0xf0]  ;;  %v3045_v7 = vor.u32 %v3418_v4, %v3044_v2  ;;  %s2508_s29 = scalar_lea.hbm %s4489_s4, %s3485_s25  ;;  %s2494_s18 = scalar_lea.sflag [#allocation4], %s3954_s1 }
  0x3d   : > { %v3173_v8 = vor.u32 %v3450_v6, %v3172_v5  ;;  %v3300_v9 = vld [vmem:[#allocation5 + $0x3e0] sm:$0xf]  ;;  %v3482_v10 = vld [vmem:[#allocation5 + $0x3ec] sm:$0xf0]  ;;  %1581 = vmatpush.bf16.msra.mxu0 %v2917_v3  ;;  %s2511_s28 = sshll.u32 %s2508_s29, 4  ;;  %s3721_s24 = scalar_lea.hbm %s4489_s4, 1024  ;;  %s2512_s28 = int_to_ptr.hbm [resolvable:$true] %s2511_s28 }
  0x3e   : > { %v2900_v11 = vld [vmem:[#allocation5 + $0xc0] sm:$0xf]  ;;  %v3301_v12 = vor.u32 %v3482_v10, %v3300_v9  ;;  %v3382_v13 = vld [vmem:[#allocation5 + $0xcc] sm:$0xf0]  ;;  %1630 = vmatpush.bf16.msra.mxu1 %v3045_v7  ;;  %s3715_s8 = sshra.s32 %s2512_s28, 4  ;;  %s3716_s8 = int_to_ptr.hbm [resolvable:$true] %s3715_s8 }
  0x3f   : > { %v3028_v14 = vld [vmem:[#allocation5 + $0x1c0] sm:$0xf]  ;;  %v3414_v15 = vld [vmem:[#allocation5 + $0x1cc] sm:$0xf0]  ;;  %1679 = vmatpush.bf16.msra.mxu2 %v3173_v8  ;;  %v2901_v16 = vor.u32 %v3382_v13, %v2900_v11  ;;  %s3717_s6 = scalar_lea.hbm %s3716_s8, 512  ;;  %p3722_p10 = scmp.lt.s32.totalorder %s3716_s8, %s4489_s4 }
  0x40   : > { %v3029_v17 = vor.u32 %v3414_v15, %v3028_v14  ;;  %v3156_v18 = vld [vmem:[#allocation5 + $0x2c0] sm:$0xf]  ;;  %v3446_v19 = vld [vmem:[#allocation5 + $0x2cc] sm:$0xf0]  ;;  %1728 = vmatpush.bf16.msra.mxu3 %v3301_v12  ;;  %p3718_p1 = scmp.ne.s32.totalorder %s3716_s8, %s3717_s6  ;;  %p3723_p12 = scmp.lt.s32.totalorder %s3721_s24, %s3717_s6 }
  0x41   : > { %v3284_v20 = vld [vmem:[#allocation5 + $0x3c0] sm:$0xf]  ;;  %v3157_v21 = vor.u32 %v3446_v19, %v3156_v18  ;;  %v3478_v22 = vld [vmem:[#allocation5 + $0x3cc] sm:$0xf0]  ;;  %1582 = vmatpush.bf16.msra.mxu0 %v2901_v16 }
  0x42   : > { %v2884_v23 = vld [vmem:[#allocation5 + $0xa0] sm:$0xf]  ;;  %v3378_v24 = vld [vmem:[#allocation5 + $0xac] sm:$0xf0]  ;;  %v3285_v25 = vor.u32 %v3478_v22, %v3284_v20  ;;  %1631 = vmatpush.bf16.msra.mxu1 %v3029_v17  ;;  %p3719_p4 = pnand %p3718_p1, %p3912_p7  ;;  %p3724_p13 = por %p3723_p12, %p3722_p10 }
  0x43   : > { %v3012_v26 = vld [vmem:[#allocation5 + $0x1a0] sm:$0xf]  ;;  %v3410_v27 = vld [vmem:[#allocation5 + $0x1ac] sm:$0xf0]  ;;  %v2885_v29 = vor.u32 %v3378_v24, %v2884_v23  ;;  %1680 = vmatpush.bf16.msra.mxu2 %v3157_v21 }
  0x44   : > { %v3140_v28 = vld [vmem:[#allocation5 + $0x2a0] sm:$0xf]  ;;  %v3442_v30 = vld [vmem:[#allocation5 + $0x2ac] sm:$0xf0]  ;;  %v3013_v33 = vor.u32 %v3410_v27, %v3012_v26  ;;  %1729 = vmatpush.bf16.msra.mxu3 %v3285_v25  ;;  %p3720_p8 = pneg %p3719_p4 }
  0x45   : > { %v3268_v31 = vld [vmem:[#allocation5 + $0x3a0] sm:$0xf]  ;;  %v3474_v32 = vld [vmem:[#allocation5 + $0x3ac] sm:$0xf0]  ;;  %v3141_v34 = vor.u32 %v3442_v30, %v3140_v28  ;;  %1583 = vmatpush.bf16.msra.mxu0 %v2885_v29  ;;  %v3324_v30 = vld [vmem:[%s3958_s21 + $0x4] sm:$0xf] }
  0x46   : > { %v2868_v35 = vld [vmem:[#allocation5 + $0x80] sm:$0xf]  ;;  %v3374_v36 = vld [vmem:[#allocation5 + $0x8c] sm:$0xf0]  ;;  %v3269_v38 = vor.u32 %v3474_v32, %v3268_v31  ;;  %1632 = vmatpush.bf16.msra.mxu1 %v3013_v33  ;;  %v2678_v31 = vld [vmem:[%s3958_s21 + $0x10] sm:$0xf0]  ;;  %p3725_p0 = pnand %p3724_p13, %p3720_p8 }
  0x47   : > { %v2996_v37 = vld [vmem:[#allocation5 + $0x180] sm:$0xf]  ;;  %v3406_v39 = vld [vmem:[#allocation5 + $0x18c] sm:$0xf0]  ;;  %v2869_v44 = vor.u32 %v3374_v36, %v2868_v35  ;;  %1681 = vmatpush.bf16.msra.mxu2 %v3141_v34  ;;  %v3448_v32 = vld [vmem:[#allocation5 + $0x2e4] sm:$0xf] }
  0x48   : > { %v3124_v40 = vld [vmem:[#allocation5 + $0x280] sm:$0xf]  ;;  %v3438_v41 = vld [vmem:[#allocation5 + $0x28c] sm:$0xf0]  ;;  %v2997_v45 = vor.u32 %v3406_v39, %v2996_v37  ;;  %1730 = vmatpush.bf16.msra.mxu3 %v3269_v38  ;;  %v3174_v33 = vld [vmem:[#allocation5 + $0x2f0] sm:$0xf0] }
  0x49   : > { %v3252_v42 = vld [vmem:[#allocation5 + $0x380] sm:$0xf]  ;;  %v3470_v43 = vld [vmem:[#allocation5 + $0x38c] sm:$0xf0]  ;;  %v3125_v46 = vor.u32 %v3438_v41, %v3124_v40  ;;  %1584 = vmatpush.bf16.msra.mxu0 %v2869_v44  ;;  %v2684_v35 = vld [vmem:[%s3958_s21 + $0x8] sm:$0xf]  ;;  %v3177_v44 = vor.u32 %v3448_v32, %v3174_v33 }
  0x4a   : > { %v2852_v47 = vld [vmem:[#allocation5 + $0x60] sm:$0xf]  ;;  %v3370_v48 = vld [vmem:[#allocation5 + $0x6c] sm:$0xf0]  ;;  %v3253_v50 = vor.u32 %v3470_v43, %v3252_v42  ;;  %1633 = vmatpush.bf16.msra.mxu1 %v2997_v45  ;;  %v3480_v36 = vld [vmem:[#allocation5 + $0x3e4] sm:$0xf] }
  0x4b   : > { %v2980_v49 = vld [vmem:[#allocation5 + $0x160] sm:$0xf]  ;;  %v3402_v51 = vld [vmem:[#allocation5 + $0x16c] sm:$0xf0]  ;;  %v2853_v56 = vor.u32 %v3370_v48, %v2852_v47  ;;  %1682 = vmatpush.bf16.msra.mxu2 %v3125_v46  ;;  %v3302_v37 = vld [vmem:[#allocation5 + $0x3f0] sm:$0xf0] }
  0x4c   : > { %v3108_v52 = vld [vmem:[#allocation5 + $0x260] sm:$0xf]  ;;  %v3434_v53 = vld [vmem:[#allocation5 + $0x26c] sm:$0xf0]  ;;  %v2981_v57 = vor.u32 %v3402_v51, %v2980_v49  ;;  %1731 = vmatpush.bf16.msra.mxu3 %v3253_v50  ;;  %v3327_v40 = vld [vmem:[%s3958_s21 + $0x14] sm:$0xf0]  ;;  %v3305_v49 = vor.u32 %v3480_v36, %v3302_v37 }
  0x4d   : > { %v3236_v54 = vld [vmem:[#allocation5 + $0x360] sm:$0xf]  ;;  %v3466_v55 = vld [vmem:[#allocation5 + $0x36c] sm:$0xf0]  ;;  %v3109_v58 = vor.u32 %v3434_v53, %v3108_v52  ;;  %1585 = vmatpush.bf16.msra.mxu0 %v2853_v56  ;;  %v3325_v41 = vld [vmem:[%s3958_s21 + $0xc] sm:$0xf]  ;;  %v3988_v53 = vor.u32 %v3324_v30, %v2678_v31 }
  0x4e   : > { %v2836_v59 = vld [vmem:[#allocation5 + $0x40] sm:$0xf]  ;;  %v3366_v60 = vld [vmem:[#allocation5 + $0x4c] sm:$0xf0]  ;;  %v3237_v62 = vor.u32 %v3466_v55, %v3236_v54  ;;  %1634 = vmatpush.bf16.msra.mxu1 %v2981_v57  ;;  %v2686_v42 = vld [vmem:[%s3958_s21 + $0x18] sm:$0xf0]  ;;  %v3990_v54 = vor.u32 %v3327_v40, %v2684_v35 }
  0x4f   : > { %v2964_v61 = vld [vmem:[#allocation5 + $0x140] sm:$0xf]  ;;  %v3398_v63 = vld [vmem:[#allocation5 + $0x14c] sm:$0xf0]  ;;  %v2837_v4 = vor.u32 %v3366_v60, %v2836_v59  ;;  %1683 = vmatpush.bf16.msra.mxu2 %v3109_v58  ;;  %v3384_v45 = vld [vmem:[#allocation5 + $0xe4] sm:$0xf]  ;;  %v3992_v57 = vor.u32 %v3325_v41, %v2686_v42 }
  0x50   : > { %v3092_v0 = vld [vmem:[#allocation5 + $0x240] sm:$0xf]  ;;  %v3430_v1 = vld [vmem:[#allocation5 + $0x24c] sm:$0xf0]  ;;  %v2965_v5 = vor.u32 %v3398_v63, %v2964_v61  ;;  %1732 = vmatpush.bf16.msra.mxu3 %v3237_v62  ;;  %v2918_v46 = vld [vmem:[#allocation5 + $0xf0] sm:$0xf0] }
  0x51   : > { %v3220_v2 = vld [vmem:[#allocation5 + $0x340] sm:$0xf]  ;;  %v3462_v3 = vld [vmem:[#allocation5 + $0x34c] sm:$0xf0]  ;;  %v3093_v6 = vor.u32 %v3430_v1, %v3092_v0  ;;  %1586 = vmatpush.bf16.msra.mxu0 %v2837_v4  ;;  %v3416_v47 = vld [vmem:[#allocation5 + $0x1e4] sm:$0xf]  ;;  %v2921_v58 = vor.u32 %v3384_v45, %v2918_v46 }
  0x52   : > { %v2820_v7 = vld [vmem:[#allocation5 + $0x20] sm:$0xf]  ;;  %v3362_v8 = vld [vmem:[#allocation5 + $0x2c] sm:$0xf0]  ;;  %v3221_v10 = vor.u32 %v3462_v3, %v3220_v2  ;;  %1635 = vmatpush.bf16.msra.mxu1 %v2965_v5  ;;  %v3046_v50 = vld [vmem:[#allocation5 + $0x1f0] sm:$0xf0] }
  0x53   : > { %v2948_v9 = vld [vmem:[#allocation5 + $0x120] sm:$0xf]  ;;  %v3394_v11 = vld [vmem:[#allocation5 + $0x12c] sm:$0xf0]  ;;  %v2821_v17 = vor.u32 %v3362_v8, %v2820_v7  ;;  %1684 = vmatpush.bf16.msra.mxu2 %v3093_v6  ;;  %v3444_v51 = vld [vmem:[#allocation5 + $0x2c4] sm:$0xf]  ;;  %v3049_v59 = vor.u32 %v3416_v47, %v3046_v50 }
  0x54   : > { %v3076_v12 = vld [vmem:[#allocation5 + $0x220] sm:$0xf]  ;;  %v3426_v13 = vld [vmem:[#allocation5 + $0x22c] sm:$0xf0]  ;;  %v2949_v21 = vor.u32 %v3394_v11, %v2948_v9  ;;  %1733 = vmatpush.bf16.msra.mxu3 %v3221_v10  ;;  %v3158_v52 = vld [vmem:[#allocation5 + $0x2d0] sm:$0xf0] }
  0x55   : > { %v3204_v14 = vld [vmem:[#allocation5 + $0x320] sm:$0xf]  ;;  %v3458_v15 = vld [vmem:[#allocation5 + $0x32c] sm:$0xf0]  ;;  %v3077_v22 = vor.u32 %v3426_v13, %v3076_v12  ;;  %1587 = vmatpush.bf16.msra.mxu0 %v2821_v17  ;;  %v3476_v55 = vld [vmem:[#allocation5 + $0x3c4] sm:$0xf]  ;;  %v3161_v60 = vor.u32 %v3444_v51, %v3158_v52 }
  0x56   : > { %v2804_v16 = vld [vmem:[#allocation5] sm:$0xf]  ;;  %v3358_v18 = vld [vmem:[#allocation5 + $0xc] sm:$0xf0]  ;;  %v3205_v26 = vor.u32 %v3458_v15, %v3204_v14  ;;  %1636 = vmatpush.bf16.msra.mxu1 %v2949_v21  ;;  %v3286_v56 = vld [vmem:[#allocation5 + $0x3d0] sm:$0xf0] }
  0x57   : > { %v2932_v19 = vld [vmem:[#allocation5 + $0x100] sm:$0xf]  ;;  %v3390_v20 = vld [vmem:[#allocation5 + $0x10c] sm:$0xf0]  ;;  %v2805_v34 = vor.u32 %v3358_v18, %v2804_v16  ;;  %1685 = vmatpush.bf16.msra.mxu2 %v3077_v22  ;;  %v3380_v61 = vld [vmem:[#allocation5 + $0xc4] sm:$0xf]  ;;  %v3289_v63 = vor.u32 %v3476_v55, %v3286_v56 }
  0x58   : > { %v3060_v23 = vld [vmem:[#allocation5 + $0x200] sm:$0xf]  ;;  %v3422_v24 = vld [vmem:[#allocation5 + $0x20c] sm:$0xf0]  ;;  %v2933_v38 = vor.u32 %v3390_v20, %v2932_v19  ;;  %1734 = vmatpush.bf16.msra.mxu3 %v3205_v26  ;;  %v2902_v62 = vld [vmem:[#allocation5 + $0xd0] sm:$0xf0] }
  0x59   : > { %v3188_v25 = vld [vmem:[#allocation5 + $0x300] sm:$0xf]  ;;  %v3454_v27 = vld [vmem:[#allocation5 + $0x30c] sm:$0xf0]  ;;  %v3061_v39 = vor.u32 %v3422_v24, %v3060_v23  ;;  %1588 = vmatpush.bf16.msra.mxu0 %v2805_v34  ;;  %v3412_v0 = vld [vmem:[#allocation5 + $0x1c4] sm:$0xf]  ;;  %v2905_v2 = vor.u32 %v3380_v61, %v2902_v62 }
  0x5a   : > { %v2676_v28 = vld [vmem:[%s3958_s21] sm:$0xf]  ;;  %v3326_v29 = vld [vmem:[%s3958_s21 + $0xc] sm:$0xf0]  ;;  %v3189_v43 = vor.u32 %v3454_v27, %v3188_v25  ;;  %1637 = vmatpush.bf16.msra.mxu1 %v2933_v38  ;;  %v3030_v1 = vld [vmem:[#allocation5 + $0x1d0] sm:$0xf0] }
  0x5b   : > { %v3986_v48 = vor.u32 %v3326_v29, %v2676_v28  ;;  %1686 = vmatpush.bf16.msra.mxu2 %v3061_v39  ;;  %v3440_v3 = vld [vmem:[#allocation5 + $0x2a4] sm:$0xf]  ;;  %v3142_v4 = vld [vmem:[#allocation5 + $0x2b0] sm:$0xf0]  ;;  %v3033_v6 = vor.u32 %v3412_v0, %v3030_v1  ;;  %v2692_v16 = vld [vmem:[%s3958_s21 + $0x20] sm:$0xf] }
  0x5c   : > { %1735 = vmatpush.bf16.msra.mxu3 %v3189_v43  ;;  %v3472_v5 = vld [vmem:[#allocation5 + $0x3a4] sm:$0xf]  ;;  %v3145_v7 = vor.u32 %v3440_v3, %v3142_v4  ;;  %v3270_v8 = vld [vmem:[#allocation5 + $0x3b0] sm:$0xf0]  ;;  %v3330_v17 = vld [vmem:[%s3958_s21 + $0x2c] sm:$0xf0] }
  0x5d   : > { %1589 = vmatmul.bf16.vlgmr.msra.gmra.mxu0 %v3986_v48  ;;  %1638 = vmatmul.bf16.vlgmr.msra.gmra.mxu1 %v3988_v53  ;;  %v3376_v9 = vld [vmem:[#allocation5 + $0xa4] sm:$0xf]  ;;  %v2886_v10 = vld [vmem:[#allocation5 + $0xb0] sm:$0xf0]  ;;  %v3273_v11 = vor.u32 %v3472_v5, %v3270_v8  ;;  %v2700_v20 = vld [vmem:[%s3958_s21 + $0x28] sm:$0xf]  ;;  %v4006_v24 = vor.u32 %v3330_v17, %v2692_v16 }
  0x5e   : > { %1687 = vmatmul.bf16.vlgmr.msra.gmra.mxu2 %v3990_v54  ;;  %1777 = vmatpush.bf16.msrb.mxu0 %v2921_v58  ;;  %v3408_v12 = vld [vmem:[#allocation5 + $0x1a4] sm:$0xf]  ;;  %v3014_v13 = vld [vmem:[#allocation5 + $0x1b0] sm:$0xf0]  ;;  %v2889_v14 = vor.u32 %v3376_v9, %v2886_v10  ;;  %v3331_v21 = vld [vmem:[%s3958_s21 + $0x34] sm:$0xf0] }
  0x5f   : > { %1875 = vmatpush.bf16.msrb.mxu2 %v3177_v44  ;;  %1736 = vmatmul.bf16.vlgmr.msra.gmra.mxu3 %v3992_v57  ;;  %v3017_v15 = vor.u32 %v3408_v12, %v3014_v13  ;;  %v3328_v18 = vld [vmem:[%s3958_s21 + $0x24] sm:$0xf]  ;;  %v2694_v19 = vld [vmem:[%s3958_s21 + $0x30] sm:$0xf0]  ;;  %v3329_v22 = vld [vmem:[%s3958_s21 + $0x2c] sm:$0xf]  ;;  %v4010_v26 = vor.u32 %v3331_v21, %v2700_v20 }
  0x60   : > { %1924 = vmatpush.bf16.msrb.mxu3 %v3305_v49  ;;  %1826 = vmatpush.bf16.msrb.mxu1 %v3049_v59  ;;  %v2702_v23 = vld [vmem:[%s3958_s21 + $0x38] sm:$0xf0]  ;;  %v4008_v25 = vor.u32 %v3328_v18, %v2694_v19  ;;  %v3436_v28 = vld [vmem:[#allocation5 + $0x284] sm:$0xf]  ;;  %v3126_v29 = vld [vmem:[#allocation5 + $0x290] sm:$0xf0] }
  0x61   : > { %v4012_v27 = vor.u32 %v3329_v22, %v2702_v23  ;;  %v3468_v30 = vld [vmem:[#allocation5 + $0x384] sm:$0xf]  ;;  %v3129_v31 = vor.u32 %v3436_v28, %v3126_v29  ;;  %v3254_v32 = vld [vmem:[#allocation5 + $0x390] sm:$0xf0]  ;;  %v2708_v40 = vld [vmem:[%s3958_s21 + $0x40] sm:$0xf] }
  0x62   : > { %1778 = vmatpush.bf16.msrb.mxu0 %v2905_v2  ;;  %v3372_v33 = vld [vmem:[#allocation5 + $0x84] sm:$0xf]  ;;  %v2870_v34 = vld [vmem:[#allocation5 + $0x90] sm:$0xf0]  ;;  %v3257_v35 = vor.u32 %v3468_v30, %v3254_v32  ;;  %v3334_v41 = vld [vmem:[%s3958_s21 + $0x4c] sm:$0xf0] }
  0x63   : > { %1876 = vmatpush.bf16.msrb.mxu2 %v3161_v60  ;;  %v2873_v36 = vor.u32 %v3372_v33, %v2870_v34  ;;  %v3404_v37 = vld [vmem:[#allocation5 + $0x184] sm:$0xf]  ;;  %v2998_v38 = vld [vmem:[#allocation5 + $0x190] sm:$0xf0]  ;;  %v2716_v44 = vld [vmem:[%s3958_s21 + $0x48] sm:$0xf]  ;;  %v4026_v49 = vor.u32 %v3334_v41, %v2708_v40 }
  0x64   : > { %1925 = vmatpush.bf16.msrb.mxu3 %v3289_v63  ;;  %1827 = vmatpush.bf16.msrb.mxu1 %v3033_v6  ;;  %v3001_v39 = vor.u32 %v3404_v37, %v2998_v38  ;;  %v3332_v42 = vld [vmem:[%s3958_s21 + $0x44] sm:$0xf]  ;;  %v2710_v43 = vld [vmem:[%s3958_s21 + $0x50] sm:$0xf0]  ;;  %v3335_v45 = vld [vmem:[%s3958_s21 + $0x54] sm:$0xf0] }
  0x65   : > { %v3333_v46 = vld [vmem:[%s3958_s21 + $0x4c] sm:$0xf]  ;;  %v2718_v47 = vld [vmem:[%s3958_s21 + $0x58] sm:$0xf0]  ;;  %v4028_v50 = vor.u32 %v3332_v42, %v2710_v43  ;;  %v4030_v51 = vor.u32 %v3335_v45, %v2716_v44  ;;  %v3432_v55 = vld [vmem:[#allocation5 + $0x264] sm:$0xf] }
  0x66   : > { %1779 = vmatpush.bf16.msrb.mxu0 %v2889_v14  ;;  %v4032_v52 = vor.u32 %v3333_v46, %v2718_v47  ;;  %v3110_v56 = vld [vmem:[#allocation5 + $0x270] sm:$0xf0]  ;;  %v3464_v58 = vld [vmem:[#allocation5 + $0x364] sm:$0xf]  ;;  %v2724_v4 = vld [vmem:[%s3958_s21 + $0x60] sm:$0xf] }
  0x67   : > { %1877 = vmatpush.bf16.msrb.mxu2 %v3145_v7  ;;  %v3113_v59 = vor.u32 %v3432_v55, %v3110_v56  ;;  %v3238_v60 = vld [vmem:[#allocation5 + $0x370] sm:$0xf0]  ;;  %v3368_v61 = vld [vmem:[#allocation5 + $0x64] sm:$0xf]  ;;  %v3338_v5 = vld [vmem:[%s3958_s21 + $0x6c] sm:$0xf0] }
  0x68   : > { %1926 = vmatpush.bf16.msrb.mxu3 %v3273_v11  ;;  %1828 = vmatpush.bf16.msrb.mxu1 %v3017_v15  ;;  %v2854_v62 = vld [vmem:[#allocation5 + $0x70] sm:$0xf0]  ;;  %v3241_v63 = vor.u32 %v3464_v58, %v3238_v60  ;;  %v3400_v1 = vld [vmem:[#allocation5 + $0x164] sm:$0xf]  ;;  %v2732_v8 = vld [vmem:[%s3958_s21 + $0x68] sm:$0xf]  ;;  %v4046_v12 = vor.u32 %v3338_v5, %v2724_v4 }
  0x69   : > { %v2857_v0 = vor.u32 %v3368_v61, %v2854_v62  ;;  %v2982_v2 = vld [vmem:[#allocation5 + $0x170] sm:$0xf0]  ;;  %v3336_v6 = vld [vmem:[%s3958_s21 + $0x64] sm:$0xf]  ;;  %v3339_v9 = vld [vmem:[%s3958_s21 + $0x74] sm:$0xf0] }
  0x6a   : > { %1780 = vmatpush.bf16.msrb.mxu0 %v2873_v36  ;;  %v2985_v3 = vor.u32 %v3400_v1, %v2982_v2  ;;  %v2726_v7 = vld [vmem:[%s3958_s21 + $0x70] sm:$0xf0]  ;;  %v3337_v10 = vld [vmem:[%s3958_s21 + $0x6c] sm:$0xf]  ;;  %v2734_v11 = vld [vmem:[%s3958_s21 + $0x78] sm:$0xf0]  ;;  %v4050_v14 = vor.u32 %v3339_v9, %v2732_v8 }
  0x6b   : > { %1878 = vmatpush.bf16.msrb.mxu2 %v3129_v31  ;;  %v4048_v13 = vor.u32 %v3336_v6, %v2726_v7  ;;  %v4052_v15 = vor.u32 %v3337_v10, %v2734_v11  ;;  %v3428_v16 = vld [vmem:[#allocation5 + $0x244] sm:$0xf]  ;;  %v3094_v17 = vld [vmem:[#allocation5 + $0x250] sm:$0xf0]  ;;  %v2740_v32 = vld [vmem:[%s3958_s21 + $0x80] sm:$0xf] }
  0x6c   : > { %1927 = vmatpush.bf16.msrb.mxu3 %v3257_v35  ;;  %1829 = vmatpush.bf16.msrb.mxu1 %v3001_v39  ;;  %v3460_v18 = vld [vmem:[#allocation5 + $0x344] sm:$0xf]  ;;  %v3097_v19 = vor.u32 %v3428_v16, %v3094_v17  ;;  %v3222_v20 = vld [vmem:[#allocation5 + $0x350] sm:$0xf0]  ;;  %v3342_v33 = vld [vmem:[%s3958_s21 + $0x8c] sm:$0xf0] }
  0x6d   : > { %1594 = vmatmul.bf16.gmra.mxu0 %v4006_v24  ;;  %1643 = vmatmul.bf16.gmra.mxu1 %v4008_v25  ;;  %v3364_v21 = vld [vmem:[#allocation5 + $0x44] sm:$0xf]  ;;  %v2838_v22 = vld [vmem:[#allocation5 + $0x50] sm:$0xf0]  ;;  %v3225_v23 = vor.u32 %v3460_v18, %v3222_v20  ;;  %v2748_v36 = vld [vmem:[%s3958_s21 + $0x88] sm:$0xf]  ;;  %v4066_v40 = vor.u32 %v3342_v33, %v2740_v32 }
  0x6e   : > { %1692 = vmatmul.bf16.gmra.mxu2 %v4010_v26  ;;  %1781 = vmatpush.bf16.msrb.mxu0 %v2857_v0  ;;  %v2841_v28 = vor.u32 %v3364_v21, %v2838_v22  ;;  %v3396_v29 = vld [vmem:[#allocation5 + $0x144] sm:$0xf]  ;;  %v2966_v30 = vld [vmem:[#allocation5 + $0x150] sm:$0xf0]  ;;  %v3343_v37 = vld [vmem:[%s3958_s21 + $0x94] sm:$0xf0] }
  0x6f   : > { %1741 = vmatmul.bf16.gmra.mxu3 %v4012_v27  ;;  %1879 = vmatpush.bf16.msrb.mxu2 %v3113_v59  ;;  %v2969_v31 = vor.u32 %v3396_v29, %v2966_v30  ;;  %v3340_v34 = vld [vmem:[%s3958_s21 + $0x84] sm:$0xf]  ;;  %v2742_v35 = vld [vmem:[%s3958_s21 + $0x90] sm:$0xf0]  ;;  %v3341_v38 = vld [vmem:[%s3958_s21 + $0x8c] sm:$0xf]  ;;  %v4070_v42 = vor.u32 %v3343_v37, %v2748_v36 }
  0x70   : > { %1928 = vmatpush.bf16.msrb.mxu3 %v3241_v63  ;;  %1830 = vmatpush.bf16.msrb.mxu1 %v2985_v3  ;;  %v2750_v39 = vld [vmem:[%s3958_s21 + $0x98] sm:$0xf0]  ;;  %v4068_v41 = vor.u32 %v3340_v34, %v2742_v35  ;;  %v3424_v44 = vld [vmem:[#allocation5 + $0x224] sm:$0xf]  ;;  %v3078_v45 = vld [vmem:[#allocation5 + $0x230] sm:$0xf0] }
  0x71   : > { %v4072_v43 = vor.u32 %v3341_v38, %v2750_v39  ;;  %v3456_v46 = vld [vmem:[#allocation5 + $0x324] sm:$0xf]  ;;  %v3081_v47 = vor.u32 %v3424_v44, %v3078_v45  ;;  %v3206_v55 = vld [vmem:[#allocation5 + $0x330] sm:$0xf0]  ;;  %v2756_v0 = vld [vmem:[%s3958_s21 + $0xa0] sm:$0xf] }
  0x72   : > { %1782 = vmatpush.bf16.msrb.mxu0 %v2841_v28  ;;  %v3360_v56 = vld [vmem:[#allocation5 + $0x24] sm:$0xf]  ;;  %v2822_v58 = vld [vmem:[#allocation5 + $0x30] sm:$0xf0]  ;;  %v3209_v59 = vor.u32 %v3456_v46, %v3206_v55  ;;  %v3346_v1 = vld [vmem:[%s3958_s21 + $0xac] sm:$0xf0] }
  0x73   : > { %1880 = vmatpush.bf16.msrb.mxu2 %v3097_v19  ;;  %v2825_v60 = vor.u32 %v3360_v56, %v2822_v58  ;;  %v3392_v61 = vld [vmem:[#allocation5 + $0x124] sm:$0xf]  ;;  %v2950_v62 = vld [vmem:[#allocation5 + $0x130] sm:$0xf0]  ;;  %v2764_v4 = vld [vmem:[%s3958_s21 + $0xa8] sm:$0xf]  ;;  %v4086_v8 = vor.u32 %v3346_v1, %v2756_v0 }
  0x74   : > { %1929 = vmatpush.bf16.msrb.mxu3 %v3225_v23  ;;  %1831 = vmatpush.bf16.msrb.mxu1 %v2969_v31  ;;  %v2953_v63 = vor.u32 %v3392_v61, %v2950_v62  ;;  %v3344_v2 = vld [vmem:[%s3958_s21 + $0xa4] sm:$0xf]  ;;  %v2758_v3 = vld [vmem:[%s3958_s21 + $0xb0] sm:$0xf0]  ;;  %v3347_v5 = vld [vmem:[%s3958_s21 + $0xb4] sm:$0xf0] }
  0x75   : > { %v3345_v6 = vld [vmem:[%s3958_s21 + $0xac] sm:$0xf]  ;;  %v2766_v7 = vld [vmem:[%s3958_s21 + $0xb8] sm:$0xf0]  ;;  %v4088_v9 = vor.u32 %v3344_v2, %v2758_v3  ;;  %v4090_v10 = vor.u32 %v3347_v5, %v2764_v4  ;;  %v3420_v16 = vld [vmem:[#allocation5 + $0x204] sm:$0xf] }
  0x76   : > { %1783 = vmatpush.bf16.msrb.mxu0 %v2825_v60  ;;  %v4092_v11 = vor.u32 %v3345_v6, %v2766_v7  ;;  %v3062_v17 = vld [vmem:[#allocation5 + $0x210] sm:$0xf0]  ;;  %v3452_v18 = vld [vmem:[#allocation5 + $0x304] sm:$0xf]  ;;  %v2772_v32 = vld [vmem:[%s3958_s21 + $0xc0] sm:$0xf] }
  0x77   : > { %1881 = vmatpush.bf16.msrb.mxu2 %v3081_v47  ;;  %v3065_v19 = vor.u32 %v3420_v16, %v3062_v17  ;;  %v3190_v20 = vld [vmem:[#allocation5 + $0x310] sm:$0xf0]  ;;  %v3356_v21 = vld [vmem:[#allocation5 + $0x4] sm:$0xf]  ;;  %v3350_v33 = vld [vmem:[%s3958_s21 + $0xcc] sm:$0xf0] }
  0x78   : > { %1930 = vmatpush.bf16.msrb.mxu3 %v3209_v59  ;;  %1832 = vmatpush.bf16.msrb.mxu1 %v2953_v63  ;;  %v2806_v22 = vld [vmem:[#allocation5 + $0x10] sm:$0xf0]  ;;  %v3193_v23 = vor.u32 %v3452_v18, %v3190_v20  ;;  %v3388_v29 = vld [vmem:[#allocation5 + $0x104] sm:$0xf]  ;;  %v2780_v36 = vld [vmem:[%s3958_s21 + $0xc8] sm:$0xf]  ;;  %v4106_v44 = vor.u32 %v3350_v33, %v2772_v32 }
  0x79   : > { %v2809_v28 = vor.u32 %v3356_v21, %v2806_v22  ;;  %v2934_v30 = vld [vmem:[#allocation5 + $0x110] sm:$0xf0]  ;;  %v3348_v34 = vld [vmem:[%s3958_s21 + $0xc4] sm:$0xf]  ;;  %v3351_v37 = vld [vmem:[%s3958_s21 + $0xd4] sm:$0xf0] }
  0x7a   : > { %v2937_v31 = vor.u32 %v3388_v29, %v2934_v30  ;;  %v2774_v35 = vld [vmem:[%s3958_s21 + $0xd0] sm:$0xf0]  ;;  %v3349_v38 = vld [vmem:[%s3958_s21 + $0xcc] sm:$0xf]  ;;  %v2782_v39 = vld [vmem:[%s3958_s21 + $0xd8] sm:$0xf0]  ;;  %v4110_v46 = vor.u32 %v3351_v37, %v2780_v36 }
  0x7b   : > { %1882 = vmatpush.bf16.msrb.mxu2 %v3065_v19  ;;  %1784 = vmatpush.bf16.msrb.mxu0 %v2809_v28  ;;  %v4108_v45 = vor.u32 %v3348_v34, %v2774_v35  ;;  %v4112_v47 = vor.u32 %v3349_v38, %v2782_v39  ;;  %v3180_v55 = vld [vmem:[#allocation5 + $0x2e8] sm:$0xf]  ;;  %v3451_v56 = vld [vmem:[#allocation5 + $0x2f4] sm:$0xf0]  ;;  %v2788_v62 = vld [vmem:[%s3958_s21 + $0xe0] sm:$0xf] }
  0x7c   : > { %1931 = vmatpush.bf16.msrb.mxu3 %v3193_v23  ;;  %1833 = vmatpush.bf16.msrb.mxu1 %v2937_v31  ;;  %v3308_v58 = vld [vmem:[#allocation5 + $0x3e8] sm:$0xf]  ;;  %v3181_v59 = vor.u32 %v3451_v56, %v3180_v55  ;;  %v3483_v60 = vld [vmem:[#allocation5 + $0x3f4] sm:$0xf0]  ;;  %v3354_v63 = vld [vmem:[%s3958_s21 + $0xec] sm:$0xf0] }
  0x7d   : > { %1599 = vmatmul.bf16.gmra.mxu0 %v4026_v49  ;;  %1648 = vmatmul.bf16.gmra.mxu1 %v4028_v50  ;;  %v3309_v61 = vor.u32 %v3483_v60, %v3308_v58  ;;  %v3352_v0 = vld [vmem:[%s3958_s21 + $0xe4] sm:$0xf]  ;;  %v2790_v1 = vld [vmem:[%s3958_s21 + $0xf0] sm:$0xf0]  ;;  %v2796_v2 = vld [vmem:[%s3958_s21 + $0xe8] sm:$0xf]  ;;  %v4126_v17 = vor.u32 %v3354_v63, %v2788_v62 }
  0x7e   : > { %1697 = vmatmul.bf16.gmra.mxu2 %v4030_v51  ;;  %v3355_v3 = vld [vmem:[%s3958_s21 + $0xf4] sm:$0xf0]  ;;  %v3353_v4 = vld [vmem:[%s3958_s21 + $0xec] sm:$0xf]  ;;  %v2798_v5 = vld [vmem:[%s3958_s21 + $0xf8] sm:$0xf0]  ;;  %v4128_v20 = vor.u32 %v3352_v0, %v2790_v1 }
  0x7f   : > { %1746 = vmatmul.bf16.gmra.mxu3 %v4032_v52  ;;  %2071 = vmatpush.bf16.msra.mxu2 %v3181_v59  ;;  %v2924_v6 = vld [vmem:[#allocation5 + $0xe8] sm:$0xf]  ;;  %v3387_v7 = vld [vmem:[#allocation5 + $0xf4] sm:$0xf0]  ;;  %v4130_v21 = vor.u32 %v3355_v3, %v2796_v2  ;;  %v4132_v23 = vor.u32 %v3353_v4, %v2798_v5  ;;  %v4138_v58 = vld [vmem:[#allocation7] sm:$0xf] }
  0x80   : > { %2120 = vmatpush.bf16.msra.mxu3 %v3309_v61  ;;  %v3052_v16 = vld [vmem:[#allocation5 + $0x1e8] sm:$0xf]  ;;  %v2925_v18 = vor.u32 %v3387_v7, %v2924_v6  ;;  %v3419_v19 = vld [vmem:[#allocation5 + $0x1f4] sm:$0xf0]  ;;  %v4144_v60 = vperm.slane %v4138_v58, 0 }
  0x81   : > { %v3053_v22 = vor.u32 %v3419_v19, %v3052_v16  ;;  %v3164_v28 = vld [vmem:[#allocation5 + $0x2c8] sm:$0xf]  ;;  %v3447_v29 = vld [vmem:[#allocation5 + $0x2d4] sm:$0xf0] }
  0x82   : > { %1973 = vmatpush.bf16.msra.mxu0 %v2925_v18  ;;  %v3292_v30 = vld [vmem:[#allocation5 + $0x3c8] sm:$0xf]  ;;  %v3165_v31 = vor.u32 %v3447_v29, %v3164_v28  ;;  %v3479_v32 = vld [vmem:[#allocation5 + $0x3d4] sm:$0xf0] }
  0x83   : > { %2022 = vmatpush.bf16.msra.mxu1 %v3053_v22  ;;  %v3293_v33 = vor.u32 %v3479_v32, %v3292_v30  ;;  %v2908_v34 = vld [vmem:[#allocation5 + $0xc8] sm:$0xf]  ;;  %v3383_v35 = vld [vmem:[#allocation5 + $0xd4] sm:$0xf0] }
  0x84   : > { %2072 = vmatpush.bf16.msra.mxu2 %v3165_v31  ;;  %v3036_v36 = vld [vmem:[#allocation5 + $0x1c8] sm:$0xf]  ;;  %v2909_v37 = vor.u32 %v3383_v35, %v2908_v34  ;;  %v3415_v38 = vld [vmem:[#allocation5 + $0x1d4] sm:$0xf0] }
  0x85   : > { %2121 = vmatpush.bf16.msra.mxu3 %v3293_v33  ;;  %v3037_v55 = vor.u32 %v3415_v38, %v3036_v36  ;;  %v355_v61 = vld [vmem:[%s3972_s30] sm:$0xff]  ;;  %v3443_v63 = vld [vmem:[#allocation5 + $0x2b4] sm:$0xf0] }
  0x86   : > { %1974 = vmatpush.bf16.msra.mxu0 %v2909_v37  ;;  %v3148_v62 = vld [vmem:[#allocation5 + $0x2a8] sm:$0xf]  ;;  %v3475_v3 = vld [vmem:[#allocation5 + $0x3b4] sm:$0xf0]  ;;  %v429_v5 = vadd.f32 %v4144_v60, %v355_v61 }
  0x87   : > { %2023 = vmatpush.bf16.msra.mxu1 %v3037_v55  ;;  %v3276_v0 = vld [vmem:[#allocation5 + $0x3a8] sm:$0xf]  ;;  %v3149_v2 = vor.u32 %v3443_v63, %v3148_v62  ;;  %v3379_v31 = vld [vmem:[#allocation5 + $0xb4] sm:$0xf0] }
  0x88   : > { %v3277_v16 = vor.u32 %v3475_v3, %v3276_v0  ;;  %v359_v28 = vld [vmem:[%s3972_s30 + $0x20] sm:$0xff]  ;;  %v3411_v35 = vld [vmem:[#allocation5 + $0x1b4] sm:$0xf0] }
  0x89   : > { %2073 = vmatpush.bf16.msra.mxu2 %v3149_v2  ;;  %v2892_v30 = vld [vmem:[#allocation5 + $0xa8] sm:$0xf]  ;;  %v433_v37 = vadd.f32 %v4144_v60, %v359_v28 }
  0x8a   : > { %2122 = vmatpush.bf16.msra.mxu3 %v3277_v16  ;;  %v3020_v32 = vld [vmem:[#allocation5 + $0x1a8] sm:$0xf]  ;;  %v2893_v34 = vor.u32 %v3379_v31, %v2892_v30 }
  0x8b   : > { %v3021_v55 = vor.u32 %v3411_v35, %v3020_v32  ;;  %v363_v63 = vld [vmem:[%s3972_s30 + $0x40] sm:$0xff] }
  0x8c   : > { %1975 = vmatpush.bf16.msra.mxu0 %v2893_v34  ;;  %v3132_v0 = vld [vmem:[#allocation5 + $0x288] sm:$0xf] }
  0x8d   : > { %1604 = vmatmul.bf16.gmra.mxu0 %v4046_v12  ;;  %1653 = vmatmul.bf16.gmra.mxu1 %v4048_v13  ;;  %v367_v30 = vld [vmem:[%s3972_s30 + $0x60] sm:$0xff] }
  0x8e   : > { %1702 = vmatmul.bf16.gmra.mxu2 %v4050_v14  ;;  %2024 = vmatpush.bf16.msra.mxu1 %v3021_v55  ;;  %v2876_v32 = vld [vmem:[#allocation5 + $0x88] sm:$0xf] }
  0x8f   : > { %1751 = vmatmul.bf16.gmra.mxu3 %v4052_v15 }
  0x9d   : > { %1609 = vmatmul.bf16.gmra.mxu0 %v4066_v40  ;;  %1658 = vmatmul.bf16.gmra.mxu1 %v4068_v41 }
  0x9e   : > { %1707 = vmatmul.bf16.gmra.mxu2 %v4070_v42 }
  0x9f   : > { %1756 = vmatmul.bf16.gmra.mxu3 %v4072_v43 }
  0xad   : > { %1614 = vmatmul.bf16.gmra.mxu0 %v4086_v8  ;;  %1663 = vmatmul.bf16.gmra.mxu1 %v4088_v9 }
  0xae   : > { %1712 = vmatmul.bf16.gmra.mxu2 %v4090_v10 }
  0xaf   : > { %1761 = vmatmul.bf16.gmra.mxu3 %v4092_v11 }
  0xbd   : > { %1619 = vmatmul.bf16.gmra.mxu0 %v4106_v44  ;;  %1668 = vmatmul.bf16.gmra.mxu1 %v4108_v45 }
  0xbe   : > { %1717 = vmatmul.bf16.gmra.mxu2 %v4110_v46 }
  0xbf   : > { %1766 = vmatmul.bf16.gmra.mxu3 %v4112_v47 }
  0xcd   : > { %1624 = vmatmul.bf16.gmra.mxu0 %v4126_v17  ;;  %1673 = vmatmul.bf16.gmra.mxu1 %v4128_v20 }
  0xce   : > { %1722 = vmatmul.bf16.gmra.mxu2 %v4130_v21 }
  0xcf   : > { %1771 = vmatmul.bf16.gmra.mxu3 %v4132_v23 }
  0xda   : > { %v1590_v39 = vpop.f32.mrf.mxu0  ;;  %v1639_v56 = vpop.f32.mrf.mxu1 }
  0xdb   : > { %v1640_v59 = vadd.f32 %v1639_v56, %v1590_v39 }
  0xdd   : > { %1785 = vmatmul.bf16.vlgmr.msrb.gmra.mxu0 %v3986_v48  ;;  %1834 = vmatmul.bf16.vlgmr.msrb.gmra.mxu1 %v3988_v53 }
  0xde   : > { %1883 = vmatmul.bf16.vlgmr.msrb.gmra.mxu2 %v3990_v54 }
  0xdf   : > { %1932 = vmatmul.bf16.vlgmr.msrb.gmra.mxu3 %v3992_v57 }
  0xe1   : > { %v1688_v1 = vpop.f32.mrf.mxu2 }
  0xe2   : > { %v1689_v4 = vadd.f32 %v1688_v1, %v1640_v59  ;;  %v1737_v6 = vpop.f32.mrf.mxu3  ;;  %v1592_v7 = vpop.f32.mrf.mxu0  ;;  %v3439_v1 = vld [vmem:[#allocation5 + $0x294] sm:$0xf0] }
  0xe3   : > { %v1641_v18 = vpop.f32.mrf.mxu1  ;;  %v3133_v3 = vor.u32 %v3439_v1, %v3132_v0  ;;  %v371_v1 = vld [vmem:[%s3972_s30 + $0x80] sm:$0xff] }
  0xe4   : > { %v1738_v19 = vadd.f32 %v1737_v6, %v1689_v4  ;;  %v1642_v29 = vadd.f32 %v1641_v18, %v1592_v7  ;;  %v3260_v4 = vld [vmem:[#allocation5 + $0x388] sm:$0xf]  ;;  %v437_v7 = vadd.f32 %v4144_v60, %v363_v63 }
  0xe5   : > { %2074 = vmatpush.bf16.msra.mxu2 %v3133_v3  ;;  %v3435_v3 = vld [vmem:[#allocation5 + $0x274] sm:$0xf0] }
  0xe6   : > { %v2365_v22 = vadd.f32 %v1738_v19, %v429_v5  ;;  %v3471_v5 = vld [vmem:[#allocation5 + $0x394] sm:$0xf0] }
  0xe7   : > { %v3261_v19 = vor.u32 %v3471_v5, %v3260_v4 }
  0xe8   : > { %2429 = vst [vmem:[%s4152_s23] sm:$0xff] %v2365_v22 }
  0xe9   : > { %v1690_v33 = vpop.f32.mrf.mxu2  ;;  %2123 = vmatpush.bf16.msra.mxu3 %v3261_v19 }
  0xea   : > { %v1691_v36 = vadd.f32 %v1690_v33, %v1642_v29  ;;  %v1739_v38 = vpop.f32.mrf.mxu3  ;;  %v1595_v39 = vpop.f32.mrf.mxu0  ;;  %v3375_v33 = vld [vmem:[#allocation5 + $0x94] sm:$0xf0] }
  0xeb   : > { %v1644_v56 = vpop.f32.mrf.mxu1  ;;  %v2877_v35 = vor.u32 %v3375_v33, %v2876_v32  ;;  %v375_v32 = vld [vmem:[%s3972_s30 + $0xa0] sm:$0xff] }
  0xec   : > { %v1740_v59 = vadd.f32 %v1739_v38, %v1691_v36  ;;  %v1645_v62 = vadd.f32 %v1644_v56, %v1595_v39  ;;  %v3004_v36 = vld [vmem:[#allocation5 + $0x188] sm:$0xf]  ;;  %v441_v39 = vadd.f32 %v4144_v60, %v367_v30 }
  0xed   : > { %1790 = vmatmul.bf16.gmra.mxu0 %v4006_v24  ;;  %1839 = vmatmul.bf16.gmra.mxu1 %v4008_v25 }
  0xee   : > { %v2369_v61 = vadd.f32 %v1740_v59, %v433_v37  ;;  %1888 = vmatmul.bf16.gmra.mxu2 %v4010_v26  ;;  %v3407_v37 = vld [vmem:[#allocation5 + $0x194] sm:$0xf0]  ;;  %1976 = vmatpush.bf16.msra.mxu0 %v2877_v35 }
  0xef   : > { %1937 = vmatmul.bf16.gmra.mxu3 %v4012_v27  ;;  %v3005_v59 = vor.u32 %v3407_v37, %v3004_v36  ;;  %v3371_v35 = vld [vmem:[#allocation5 + $0x74] sm:$0xf0] }
  0xf0   : > { %2433 = vst [vmem:[%s4152_s23 + $0x20] sm:$0xff] %v2369_v61 }
  0xf1   : > { %v1693_v2 = vpop.f32.mrf.mxu2  ;;  %2025 = vmatpush.bf16.msra.mxu1 %v3005_v59 }
  0xf2   : > { %v1694_v6 = vadd.f32 %v1693_v2, %v1645_v62  ;;  %v1742_v16 = vpop.f32.mrf.mxu3  ;;  %v1597_v18 = vpop.f32.mrf.mxu0  ;;  %v3116_v2 = vld [vmem:[#allocation5 + $0x268] sm:$0xf] }
  0xf3   : > { %v1646_v22 = vpop.f32.mrf.mxu1  ;;  %v3117_v5 = vor.u32 %v3435_v3, %v3116_v2  ;;  %v379_v3 = vld [vmem:[%s3972_s30 + $0xc0] sm:$0xff] }
  0xf4   : > { %v1743_v28 = vadd.f32 %v1742_v16, %v1694_v6  ;;  %v1647_v31 = vadd.f32 %v1646_v22, %v1597_v18  ;;  %v3244_v6 = vld [vmem:[#allocation5 + $0x368] sm:$0xf]  ;;  %v445_v18 = vadd.f32 %v4144_v60, %v371_v1 }
  0xf5   : > { %2075 = vmatpush.bf16.msra.mxu2 %v3117_v5  ;;  %v3431_v5 = vld [vmem:[#allocation5 + $0x254] sm:$0xf0] }
  0xf6   : > { %v2373_v29 = vadd.f32 %v1743_v28, %v437_v7  ;;  %v3467_v7 = vld [vmem:[#allocation5 + $0x374] sm:$0xf0] }
  0xf7   : > { %v3245_v28 = vor.u32 %v3467_v7, %v3244_v6 }
  0xf8   : > { %2437 = vst [vmem:[%s4152_s23 + $0x40] sm:$0xff] %v2373_v29 }
  0xf9   : > { %v1695_v34 = vpop.f32.mrf.mxu2  ;;  %2124 = vmatpush.bf16.msra.mxu3 %v3245_v28 }
  0xfa   : > { %v1696_v38 = vadd.f32 %v1695_v34, %v1647_v31  ;;  %v1744_v55 = vpop.f32.mrf.mxu3  ;;  %v1600_v56 = vpop.f32.mrf.mxu0  ;;  %v2860_v34 = vld [vmem:[#allocation5 + $0x68] sm:$0xf] }
  0xfb   : > { %v1649_v61 = vpop.f32.mrf.mxu1  ;;  %v2861_v37 = vor.u32 %v3371_v35, %v2860_v34  ;;  %v383_v34 = vld [vmem:[%s3972_s30 + $0xe0] sm:$0xff] }
  0xfc   : > { %v1745_v62 = vadd.f32 %v1744_v55, %v1696_v38  ;;  %v1650_v0 = vadd.f32 %v1649_v61, %v1600_v56  ;;  %v2988_v38 = vld [vmem:[#allocation5 + $0x168] sm:$0xf]  ;;  %v449_v56 = vadd.f32 %v4144_v60, %v375_v32 }
  0xfd   : > { %1795 = vmatmul.bf16.gmra.mxu0 %v4026_v49  ;;  %1844 = vmatmul.bf16.gmra.mxu1 %v4028_v50 }
  0xfe   : > { %v2377_v63 = vadd.f32 %v1745_v62, %v441_v39  ;;  %1893 = vmatmul.bf16.gmra.mxu2 %v4030_v51  ;;  %v3403_v39 = vld [vmem:[#allocation5 + $0x174] sm:$0xf0]  ;;  %1977 = vmatpush.bf16.msra.mxu0 %v2861_v37 }
  0xff   : > { %1942 = vmatmul.bf16.gmra.mxu3 %v4032_v52  ;;  %v2989_v62 = vor.u32 %v3403_v39, %v2988_v38  ;;  %v3367_v37 = vld [vmem:[#allocation5 + $0x54] sm:$0xf0] }
 0x100   : > { %2441 = vst [vmem:[%s4152_s23 + $0x60] sm:$0xff] %v2377_v63 }
 0x101   : > { %v1698_v4 = vpop.f32.mrf.mxu2  ;;  %2026 = vmatpush.bf16.msra.mxu1 %v2989_v62 }
 0x102   : > { %v1699_v16 = vadd.f32 %v1698_v4, %v1650_v0  ;;  %v1747_v19 = vpop.f32.mrf.mxu3  ;;  %v1602_v22 = vpop.f32.mrf.mxu0  ;;  %v3100_v4 = vld [vmem:[#allocation5 + $0x248] sm:$0xf] }
 0x103   : > { %v1651_v29 = vpop.f32.mrf.mxu1  ;;  %v3101_v7 = vor.u32 %v3431_v5, %v3100_v4  ;;  %v387_v5 = vld [vmem:[%s3972_s30 + $0x100] sm:$0xff] }
 0x104   : > { %v1748_v30 = vadd.f32 %v1747_v19, %v1699_v16  ;;  %v1652_v33 = vadd.f32 %v1651_v29, %v1602_v22  ;;  %v3228_v16 = vld [vmem:[#allocation5 + $0x348] sm:$0xf]  ;;  %v453_v22 = vadd.f32 %v4144_v60, %v379_v3 }
 0x105   : > { %2076 = vmatpush.bf16.msra.mxu2 %v3101_v7  ;;  %v3427_v7 = vld [vmem:[#allocation5 + $0x234] sm:$0xf0] }
 0x106   : > { %v2381_v31 = vadd.f32 %v1748_v30, %v445_v18  ;;  %v3463_v18 = vld [vmem:[#allocation5 + $0x354] sm:$0xf0] }
 0x107   : > { %v3229_v30 = vor.u32 %v3463_v18, %v3228_v16 }
 0x108   : > { %2445 = vst [vmem:[%s4152_s23 + $0x80] sm:$0xff] %v2381_v31 }
 0x109   : > { %v1700_v36 = vpop.f32.mrf.mxu2  ;;  %2125 = vmatpush.bf16.msra.mxu3 %v3229_v30 }
 0x10a   : > { %v1701_v55 = vadd.f32 %v1700_v36, %v1652_v33  ;;  %v1749_v59 = vpop.f32.mrf.mxu3  ;;  %v1605_v61 = vpop.f32.mrf.mxu0  ;;  %v2844_v36 = vld [vmem:[#allocation5 + $0x48] sm:$0xf] }
 0x10b   : > { %v1654_v63 = vpop.f32.mrf.mxu1  ;;  %v2845_v39 = vor.u32 %v3367_v37, %v2844_v36  ;;  %v391_v36 = vld [vmem:[%s3972_s30 + $0x120] sm:$0xff] }
 0x10c   : > { %v1750_v0 = vadd.f32 %v1749_v59, %v1701_v55  ;;  %v1655_v2 = vadd.f32 %v1654_v63, %v1605_v61  ;;  %v2972_v55 = vld [vmem:[#allocation5 + $0x148] sm:$0xf]  ;;  %v457_v61 = vadd.f32 %v4144_v60, %v383_v34 }
 0x10d   : > { %1800 = vmatmul.bf16.gmra.mxu0 %v4046_v12  ;;  %1849 = vmatmul.bf16.gmra.mxu1 %v4048_v13 }
 0x10e   : > { %v2385_v1 = vadd.f32 %v1750_v0, %v449_v56  ;;  %1898 = vmatmul.bf16.gmra.mxu2 %v4050_v14  ;;  %v3399_v56 = vld [vmem:[#allocation5 + $0x154] sm:$0xf0]  ;;  %1978 = vmatpush.bf16.msra.mxu0 %v2845_v39 }
 0x10f   : > { %1947 = vmatmul.bf16.gmra.mxu3 %v4052_v15  ;;  %v2973_v0 = vor.u32 %v3399_v56, %v2972_v55  ;;  %v3363_v39 = vld [vmem:[#allocation5 + $0x34] sm:$0xf0] }
 0x110   : > { %2449 = vst [vmem:[%s4152_s23 + $0xa0] sm:$0xff] %v2385_v1 }
 0x111   : > { %v1703_v6 = vpop.f32.mrf.mxu2  ;;  %2027 = vmatpush.bf16.msra.mxu1 %v2973_v0 }
 0x112   : > { %v1704_v19 = vadd.f32 %v1703_v6, %v1655_v2  ;;  %v1752_v28 = vpop.f32.mrf.mxu3  ;;  %v1607_v29 = vpop.f32.mrf.mxu0  ;;  %v3084_v6 = vld [vmem:[#allocation5 + $0x228] sm:$0xf] }
 0x113   : > { %v1656_v31 = vpop.f32.mrf.mxu1  ;;  %v3085_v18 = vor.u32 %v3427_v7, %v3084_v6  ;;  %v395_v7 = vld [vmem:[%s3972_s30 + $0x140] sm:$0xff] }
 0x114   : > { %v1753_v32 = vadd.f32 %v1752_v28, %v1704_v19  ;;  %v1657_v35 = vadd.f32 %v1656_v31, %v1607_v29  ;;  %v3212_v19 = vld [vmem:[#allocation5 + $0x328] sm:$0xf]  ;;  %v461_v29 = vadd.f32 %v4144_v60, %v387_v5 }
 0x115   : > { %2077 = vmatpush.bf16.msra.mxu2 %v3085_v18  ;;  %v3423_v18 = vld [vmem:[#allocation5 + $0x214] sm:$0xf0] }
 0x116   : > { %v2389_v33 = vadd.f32 %v1753_v32, %v453_v22  ;;  %v3459_v22 = vld [vmem:[#allocation5 + $0x334] sm:$0xf0] }
 0x117   : > { %v3213_v32 = vor.u32 %v3459_v22, %v3212_v19 }
 0x118   : > { %2453 = vst [vmem:[%s4152_s23 + $0xc0] sm:$0xff] %v2389_v33 }
 0x119   : > { %v1705_v38 = vpop.f32.mrf.mxu2  ;;  %2126 = vmatpush.bf16.msra.mxu3 %v3213_v32 }
 0x11a   : > { %v1706_v59 = vadd.f32 %v1705_v38, %v1657_v35  ;;  %v1754_v62 = vpop.f32.mrf.mxu3  ;;  %v1610_v63 = vpop.f32.mrf.mxu0  ;;  %v2828_v38 = vld [vmem:[#allocation5 + $0x28] sm:$0xf] }
 0x11b   : > { %v1659_v1 = vpop.f32.mrf.mxu1  ;;  %v2829_v56 = vor.u32 %v3363_v39, %v2828_v38  ;;  %v399_v38 = vld [vmem:[%s3972_s30 + $0x160] sm:$0xff] }
 0x11c   : > { %v1755_v2 = vadd.f32 %v1754_v62, %v1706_v59  ;;  %v1660_v4 = vadd.f32 %v1659_v1, %v1610_v63  ;;  %v2956_v59 = vld [vmem:[#allocation5 + $0x128] sm:$0xf]  ;;  %v465_v63 = vadd.f32 %v4144_v60, %v391_v36 }
 0x11d   : > { %1805 = vmatmul.bf16.gmra.mxu0 %v4066_v40  ;;  %1854 = vmatmul.bf16.gmra.mxu1 %v4068_v41 }
 0x11e   : > { %v2393_v3 = vadd.f32 %v1755_v2, %v457_v61  ;;  %1903 = vmatmul.bf16.gmra.mxu2 %v4070_v42  ;;  %v3395_v61 = vld [vmem:[#allocation5 + $0x134] sm:$0xf0]  ;;  %1979 = vmatpush.bf16.msra.mxu0 %v2829_v56 }
 0x11f   : > { %1952 = vmatmul.bf16.gmra.mxu3 %v4072_v43  ;;  %v2957_v2 = vor.u32 %v3395_v61, %v2956_v59  ;;  %v3359_v56 = vld [vmem:[#allocation5 + $0x14] sm:$0xf0] }
 0x120   : > { %2457 = vst [vmem:[%s4152_s23 + $0xe0] sm:$0xff] %v2393_v3 }
 0x121   : > { %v1708_v16 = vpop.f32.mrf.mxu2  ;;  %2028 = vmatpush.bf16.msra.mxu1 %v2957_v2 }
 0x122   : > { %v1709_v28 = vadd.f32 %v1708_v16, %v1660_v4  ;;  %v1757_v30 = vpop.f32.mrf.mxu3  ;;  %v1612_v31 = vpop.f32.mrf.mxu0  ;;  %v3068_v16 = vld [vmem:[#allocation5 + $0x208] sm:$0xf] }
 0x123   : > { %v1661_v33 = vpop.f32.mrf.mxu1  ;;  %v3069_v22 = vor.u32 %v3423_v18, %v3068_v16  ;;  %v403_v18 = vld [vmem:[%s3972_s30 + $0x180] sm:$0xff] }
 0x124   : > { %v1758_v34 = vadd.f32 %v1757_v30, %v1709_v28  ;;  %v1662_v37 = vadd.f32 %v1661_v33, %v1612_v31  ;;  %v3196_v28 = vld [vmem:[#allocation5 + $0x308] sm:$0xf]  ;;  %v469_v31 = vadd.f32 %v4144_v60, %v395_v7 }
 0x125   : > { %2078 = vmatpush.bf16.msra.mxu2 %v3069_v22  ;;  %v3182_v22 = vld [vmem:[#allocation5 + $0x2f8] sm:$0xf0] }
 0x126   : > { %v2397_v35 = vadd.f32 %v1758_v34, %v461_v29  ;;  %v3455_v29 = vld [vmem:[#allocation5 + $0x314] sm:$0xf0] }
 0x127   : > { %v3197_v34 = vor.u32 %v3455_v29, %v3196_v28 }
 0x128   : > { %2461 = vst [vmem:[%s4152_s23 + $0x100] sm:$0xff] %v2397_v35 }
 0x129   : > { %v1710_v55 = vpop.f32.mrf.mxu2  ;;  %2127 = vmatpush.bf16.msra.mxu3 %v3197_v34 }
 0x12a   : > { %v1711_v62 = vadd.f32 %v1710_v55, %v1662_v37  ;;  %v1759_v0 = vpop.f32.mrf.mxu3  ;;  %v1615_v1 = vpop.f32.mrf.mxu0  ;;  %v2812_v55 = vld [vmem:[#allocation5 + $0x8] sm:$0xf] }
 0x12b   : > { %v1664_v3 = vpop.f32.mrf.mxu1  ;;  %v2813_v61 = vor.u32 %v3359_v56, %v2812_v55  ;;  %v407_v55 = vld [vmem:[%s3972_s30 + $0x1a0] sm:$0xff] }
 0x12c   : > { %v1760_v4 = vadd.f32 %v1759_v0, %v1711_v62  ;;  %v1665_v6 = vadd.f32 %v1664_v3, %v1615_v1  ;;  %v2940_v62 = vld [vmem:[#allocation5 + $0x108] sm:$0xf]  ;;  %v473_v1 = vadd.f32 %v4144_v60, %v399_v38 }
 0x12d   : > { %1810 = vmatmul.bf16.gmra.mxu0 %v4086_v8  ;;  %1859 = vmatmul.bf16.gmra.mxu1 %v4088_v9 }
 0x12e   : > { %v2401_v5 = vadd.f32 %v1760_v4, %v465_v63  ;;  %1908 = vmatmul.bf16.gmra.mxu2 %v4090_v10  ;;  %v3391_v63 = vld [vmem:[#allocation5 + $0x114] sm:$0xf0]  ;;  %1980 = vmatpush.bf16.msra.mxu0 %v2813_v61  ;;  %v2926_v61 = vld [vmem:[#allocation5 + $0xf8] sm:$0xf0] }
 0x12f   : > { %1957 = vmatmul.bf16.gmra.mxu3 %v4092_v11  ;;  %v2941_v4 = vor.u32 %v3391_v63, %v2940_v62 }
 0x130   : > { %2465 = vst [vmem:[%s4152_s23 + $0x120] sm:$0xff] %v2401_v5 }
 0x131   : > { %v1713_v19 = vpop.f32.mrf.mxu2  ;;  %2029 = vmatpush.bf16.msra.mxu1 %v2941_v4 }
 0x132   : > { %v1714_v30 = vadd.f32 %v1713_v19, %v1665_v6  ;;  %v1762_v32 = vpop.f32.mrf.mxu3  ;;  %v1617_v33 = vpop.f32.mrf.mxu0  ;;  %v3449_v19 = vld [vmem:[#allocation5 + $0x2ec] sm:$0xf] }
 0x133   : > { %v1666_v35 = vpop.f32.mrf.mxu1  ;;  %v3185_v29 = vor.u32 %v3449_v19, %v3182_v22  ;;  %v411_v22 = vld [vmem:[%s3972_s30 + $0x1c0] sm:$0xff] }
 0x134   : > { %v1763_v36 = vadd.f32 %v1762_v32, %v1714_v30  ;;  %v1667_v39 = vadd.f32 %v1666_v35, %v1617_v33  ;;  %v3481_v30 = vld [vmem:[#allocation5 + $0x3ec] sm:$0xf]  ;;  %v477_v33 = vadd.f32 %v4144_v60, %v403_v18 }
 0x135   : > { %2267 = vmatpush.bf16.msrb.mxu2 %v3185_v29  ;;  %v3166_v29 = vld [vmem:[#allocation5 + $0x2d8] sm:$0xf0] }
 0x136   : > { %v2405_v37 = vadd.f32 %v1763_v36, %v469_v31  ;;  %v3310_v31 = vld [vmem:[#allocation5 + $0x3f8] sm:$0xf0] }
 0x137   : > { %v3313_v36 = vor.u32 %v3481_v30, %v3310_v31 }
 0x138   : > { %2469 = vst [vmem:[%s4152_s23 + $0x140] sm:$0xff] %v2405_v37 }
 0x139   : > { %v1715_v59 = vpop.f32.mrf.mxu2  ;;  %2316 = vmatpush.bf16.msrb.mxu3 %v3313_v36 }
 0x13a   : > { %v1716_v0 = vadd.f32 %v1715_v59, %v1667_v39  ;;  %v1764_v2 = vpop.f32.mrf.mxu3  ;;  %v1620_v3 = vpop.f32.mrf.mxu0  ;;  %v3385_v59 = vld [vmem:[#allocation5 + $0xec] sm:$0xf] }
 0x13b   : > { %v1669_v5 = vpop.f32.mrf.mxu1  ;;  %v2929_v63 = vor.u32 %v3385_v59, %v2926_v61  ;;  %v415_v59 = vld [vmem:[%s3972_s30 + $0x1e0] sm:$0xff] }
 0x13c   : > { %v1765_v6 = vadd.f32 %v1764_v2, %v1716_v0  ;;  %v1670_v16 = vadd.f32 %v1669_v5, %v1620_v3  ;;  %v3417_v0 = vld [vmem:[#allocation5 + $0x1ec] sm:$0xf]  ;;  %v481_v3 = vadd.f32 %v4144_v60, %v407_v55 }
 0x13d   : > { %1815 = vmatmul.bf16.gmra.mxu0 %v4106_v44  ;;  %1864 = vmatmul.bf16.gmra.mxu1 %v4108_v45 }
 0x13e   : > { %v2409_v7 = vadd.f32 %v1765_v6, %v473_v1  ;;  %1913 = vmatmul.bf16.gmra.mxu2 %v4110_v46  ;;  %v3054_v1 = vld [vmem:[#allocation5 + $0x1f8] sm:$0xf0]  ;;  %2169 = vmatpush.bf16.msrb.mxu0 %v2929_v63 }
 0x13f   : > { %1962 = vmatmul.bf16.gmra.mxu3 %v4112_v47  ;;  %v3057_v6 = vor.u32 %v3417_v0, %v3054_v1  ;;  %v2910_v63 = vld [vmem:[#allocation5 + $0xd8] sm:$0xf0] }
 0x140   : > { %2473 = vst [vmem:[%s4152_s23 + $0x160] sm:$0xff] %v2409_v7 }
 0x141   : > { %v1718_v28 = vpop.f32.mrf.mxu2  ;;  %2218 = vmatpush.bf16.msrb.mxu1 %v3057_v6 }
 0x142   : > { %v1719_v32 = vadd.f32 %v1718_v28, %v1670_v16  ;;  %v1767_v34 = vpop.f32.mrf.mxu3  ;;  %v1622_v35 = vpop.f32.mrf.mxu0  ;;  %v3445_v28 = vld [vmem:[#allocation5 + $0x2cc] sm:$0xf] }
 0x143   : > { %v1671_v37 = vpop.f32.mrf.mxu1  ;;  %v3169_v31 = vor.u32 %v3445_v28, %v3166_v29  ;;  %v4230_v29 = vperm.slane %v4138_v58, 1 }
 0x144   : > { %v1768_v38 = vadd.f32 %v1767_v34, %v1719_v32  ;;  %v1672_v56 = vadd.f32 %v1671_v37, %v1622_v35  ;;  %v3477_v32 = vld [vmem:[#allocation5 + $0x3cc] sm:$0xf]  ;;  %v485_v35 = vadd.f32 %v4144_v60, %v411_v22 }
 0x145   : > { %2268 = vmatpush.bf16.msrb.mxu2 %v3169_v31  ;;  %v3150_v31 = vld [vmem:[#allocation5 + $0x2b8] sm:$0xf0] }
 0x146   : > { %v2413_v39 = vadd.f32 %v1768_v38, %v477_v33  ;;  %v3294_v33 = vld [vmem:[#allocation5 + $0x3d8] sm:$0xf0] }
 0x147   : > { %v3297_v38 = vor.u32 %v3477_v32, %v3294_v33 }
 0x148   : > { %2477 = vst [vmem:[%s4152_s23 + $0x180] sm:$0xff] %v2413_v39 }
 0x149   : > { %v1720_v62 = vpop.f32.mrf.mxu2  ;;  %2317 = vmatpush.bf16.msrb.mxu3 %v3297_v38 }
 0x14a   : > { %v1721_v2 = vadd.f32 %v1720_v62, %v1672_v56  ;;  %v1769_v4 = vpop.f32.mrf.mxu3  ;;  %v1625_v5 = vpop.f32.mrf.mxu0  ;;  %v3381_v62 = vld [vmem:[#allocation5 + $0xcc] sm:$0xf] }
 0x14b   : > { %v1674_v7 = vpop.f32.mrf.mxu1  ;;  %v2913_v1 = vor.u32 %v3381_v62, %v2910_v63  ;;  %v3377_v63 = vld [vmem:[#allocation5 + $0xac] sm:$0xf] }
 0x14c   : > { %v1770_v16 = vadd.f32 %v1769_v4, %v1721_v2  ;;  %v1675_v19 = vadd.f32 %v1674_v7, %v1625_v5  ;;  %v3413_v2 = vld [vmem:[#allocation5 + $0x1cc] sm:$0xf]  ;;  %v489_v5 = vadd.f32 %v4144_v60, %v415_v59 }
 0x14d   : > { %1820 = vmatmul.bf16.gmra.mxu0 %v4126_v17  ;;  %1869 = vmatmul.bf16.gmra.mxu1 %v4128_v20  ;;  %v356_v60 = vld [vmem:[%s3972_s30 + $0x8] sm:$0xff] }
 0x14e   : > { %v2417_v18 = vadd.f32 %v1770_v16, %v481_v3  ;;  %1918 = vmatmul.bf16.gmra.mxu2 %v4130_v21  ;;  %v3038_v3 = vld [vmem:[#allocation5 + $0x1d8] sm:$0xf0]  ;;  %2170 = vmatpush.bf16.msrb.mxu0 %v2913_v1 }
 0x14f   : > { %1967 = vmatmul.bf16.gmra.mxu3 %v4132_v23  ;;  %v3041_v16 = vor.u32 %v3413_v2, %v3038_v3  ;;  %v3409_v3 = vld [vmem:[#allocation5 + $0x1ac] sm:$0xf] }
 0x150   : > { %2481 = vst [vmem:[%s4152_s23 + $0x1a0] sm:$0xff] %v2417_v18 }
 0x151   : > { %v1723_v30 = vpop.f32.mrf.mxu2  ;;  %2219 = vmatpush.bf16.msrb.mxu1 %v3041_v16 }
 0x152   : > { %v1724_v34 = vadd.f32 %v1723_v30, %v1675_v19  ;;  %v1772_v36 = vpop.f32.mrf.mxu3  ;;  %v1627_v37 = vpop.f32.mrf.mxu0  ;;  %v3441_v30 = vld [vmem:[#allocation5 + $0x2ac] sm:$0xf] }
 0x153   : > { %v1676_v39 = vpop.f32.mrf.mxu1  ;;  %v3153_v33 = vor.u32 %v3441_v30, %v3150_v31  ;;  %v364_v30 = vld [vmem:[%s3972_s30 + $0x48] sm:$0xff] }
 0x154   : > { %v1773_v55 = vadd.f32 %v1772_v36, %v1724_v34  ;;  %v1677_v61 = vadd.f32 %v1676_v39, %v1627_v37  ;;  %v3473_v34 = vld [vmem:[#allocation5 + $0x3ac] sm:$0xf]  ;;  %v430_v37 = vadd.f32 %v4230_v29, %v356_v60 }
 0x155   : > { %2269 = vmatpush.bf16.msrb.mxu2 %v3153_v33  ;;  %v3437_v31 = vld [vmem:[#allocation5 + $0x28c] sm:$0xf] }
 0x156   : > { %v2421_v56 = vadd.f32 %v1773_v55, %v485_v35  ;;  %v3278_v35 = vld [vmem:[#allocation5 + $0x3b8] sm:$0xf0] }
 0x157   : > { %v3281_v55 = vor.u32 %v3473_v34, %v3278_v35  ;;  %v3469_v35 = vld [vmem:[#allocation5 + $0x38c] sm:$0xf] }
 0x158   : > { %2485 = vst [vmem:[%s4152_s23 + $0x1c0] sm:$0xff] %v2421_v56 }
 0x159   : > { %v1725_v0 = vpop.f32.mrf.mxu2  ;;  %2318 = vmatpush.bf16.msrb.mxu3 %v3281_v55 }
 0x15a   : > { %v1726_v4 = vadd.f32 %v1725_v0, %v1677_v61  ;;  %v1774_v6 = vpop.f32.mrf.mxu3  ;;  %v1786_v7 = vpop.f32.mrf.mxu0  ;;  %v360_v61 = vld [vmem:[%s3972_s30 + $0x28] sm:$0xff]  ;;  %v2894_v0 = vld [vmem:[#allocation5 + $0xb8] sm:$0xf0] }
 0x15b   : > { %v1835_v18 = vpop.f32.mrf.mxu1  ;;  %v2897_v2 = vor.u32 %v3377_v63, %v2894_v0  ;;  %v3373_v0 = vld [vmem:[#allocation5 + $0x8c] sm:$0xf] }
 0x15c   : > { %v1775_v19 = vadd.f32 %v1774_v6, %v1726_v4  ;;  %v1836_v28 = vadd.f32 %v1835_v18, %v1786_v7  ;;  %v3022_v4 = vld [vmem:[#allocation5 + $0x1b8] sm:$0xf0]  ;;  %v434_v6 = vadd.f32 %v4230_v29, %v360_v61 }
 0x15d   : > { %1981 = vmatmul.bf16.vlgmr.msra.gmra.mxu0 %v3986_v48  ;;  %2030 = vmatmul.bf16.vlgmr.msra.gmra.mxu1 %v3988_v53  ;;  %v3025_v18 = vor.u32 %v3409_v3, %v3022_v4  ;;  %v3405_v4 = vld [vmem:[#allocation5 + $0x18c] sm:$0xf] }
 0x15e   : > { %v2425_v22 = vadd.f32 %v1775_v19, %v489_v5  ;;  %2079 = vmatmul.bf16.vlgmr.msra.gmra.mxu2 %v3990_v54  ;;  %2171 = vmatpush.bf16.msrb.mxu0 %v2897_v2 }
 0x15f   : > { %2128 = vmatmul.bf16.vlgmr.msra.gmra.mxu3 %v3992_v57  ;;  %2220 = vmatpush.bf16.msrb.mxu1 %v3025_v18 }
 0x160   : > { %2489 = vst [vmem:[%s4152_s23 + $0x1e0] sm:$0xff] %v2425_v22 }
 0x161   : > { %v1884_v32 = vpop.f32.mrf.mxu2 }
 0x162   : > { %v1885_v36 = vadd.f32 %v1884_v32, %v1836_v28  ;;  %v1933_v38 = vpop.f32.mrf.mxu3  ;;  %v1788_v39 = vpop.f32.mrf.mxu0  ;;  %v3134_v32 = vld [vmem:[#allocation5 + $0x298] sm:$0xf0] }
 0x163   : > { %v1837_v58 = vpop.f32.mrf.mxu1  ;;  %v3137_v34 = vor.u32 %v3437_v31, %v3134_v32  ;;  %v372_v31 = vld [vmem:[%s3972_s30 + $0x88] sm:$0xff] }
 0x164   : > { %v1934_v56 = vadd.f32 %v1933_v38, %v1885_v36  ;;  %v1838_v62 = vadd.f32 %v1837_v58, %v1788_v39  ;;  %v3262_v36 = vld [vmem:[#allocation5 + $0x398] sm:$0xf0]  ;;  %v438_v38 = vadd.f32 %v4230_v29, %v364_v30  ;;  %v3433_v32 = vld [vmem:[#allocation5 + $0x26c] sm:$0xf] }
 0x165   : > { %v3265_v58 = vor.u32 %v3469_v35, %v3262_v36  ;;  %2270 = vmatpush.bf16.msrb.mxu2 %v3137_v34  ;;  %v3465_v36 = vld [vmem:[#allocation5 + $0x36c] sm:$0xf] }
 0x166   : > { %v2366_v59 = vadd.f32 %v1934_v56, %v430_v37 }
 0x167   : > { %2319 = vmatpush.bf16.msrb.mxu3 %v3265_v58 }
 0x168   : > { %2430 = vst [vmem:[%s4152_s23 + $0x8] sm:$0xff] %v2366_v59 }
 0x169   : > { %v1886_v1 = vpop.f32.mrf.mxu2 }
 0x16a   : > { %v1887_v5 = vadd.f32 %v1886_v1, %v1838_v62  ;;  %v1935_v7 = vpop.f32.mrf.mxu3  ;;  %v1791_v16 = vpop.f32.mrf.mxu0  ;;  %v368_v62 = vld [vmem:[%s3972_s30 + $0x68] sm:$0xff]  ;;  %v2878_v1 = vld [vmem:[#allocation5 + $0x98] sm:$0xf0] }
 0x16b   : > { %v1840_v19 = vpop.f32.mrf.mxu1  ;;  %v2881_v3 = vor.u32 %v3373_v0, %v2878_v1  ;;  %v3369_v1 = vld [vmem:[#allocation5 + $0x6c] sm:$0xf] }
 0x16c   : > { %v1936_v22 = vadd.f32 %v1935_v7, %v1887_v5  ;;  %v1841_v60 = vadd.f32 %v1840_v19, %v1791_v16  ;;  %v3006_v5 = vld [vmem:[#allocation5 + $0x198] sm:$0xf0]  ;;  %v442_v7 = vadd.f32 %v4230_v29, %v368_v62 }
 0x16d   : > { %1986 = vmatmul.bf16.gmra.mxu0 %v4006_v24  ;;  %2035 = vmatmul.bf16.gmra.mxu1 %v4008_v25  ;;  %v3009_v19 = vor.u32 %v3405_v4, %v3006_v5  ;;  %v3401_v5 = vld [vmem:[#allocation5 + $0x16c] sm:$0xf] }
 0x16e   : > { %v2370_v28 = vadd.f32 %v1936_v22, %v434_v6  ;;  %2084 = vmatmul.bf16.gmra.mxu2 %v4010_v26  ;;  %2172 = vmatpush.bf16.msrb.mxu0 %v2881_v3 }
 0x16f   : > { %2133 = vmatmul.bf16.gmra.mxu3 %v4012_v27  ;;  %2221 = vmatpush.bf16.msrb.mxu1 %v3009_v19 }
 0x170   : > { %2434 = vst [vmem:[%s4152_s23 + $0x28] sm:$0xff] %v2370_v28 }
 0x171   : > { %v1889_v33 = vpop.f32.mrf.mxu2 }
 0x172   : > { %v1890_v37 = vadd.f32 %v1889_v33, %v1841_v60  ;;  %v1938_v39 = vpop.f32.mrf.mxu3  ;;  %v1793_v55 = vpop.f32.mrf.mxu0  ;;  %v3118_v33 = vld [vmem:[#allocation5 + $0x278] sm:$0xf0] }
 0x173   : > { %v1842_v56 = vpop.f32.mrf.mxu1  ;;  %v3121_v35 = vor.u32 %v3433_v32, %v3118_v33  ;;  %v380_v32 = vld [vmem:[%s3972_s30 + $0xc8] sm:$0xff] }
 0x174   : > { %v1939_v59 = vadd.f32 %v1938_v39, %v1890_v37  ;;  %v1843_v63 = vadd.f32 %v1842_v56, %v1793_v55  ;;  %v3246_v37 = vld [vmem:[#allocation5 + $0x378] sm:$0xf0]  ;;  %v446_v39 = vadd.f32 %v4230_v29, %v372_v31  ;;  %v3429_v33 = vld [vmem:[#allocation5 + $0x24c] sm:$0xf] }
 0x175   : > { %v3249_v56 = vor.u32 %v3465_v36, %v3246_v37  ;;  %2271 = vmatpush.bf16.msrb.mxu2 %v3121_v35  ;;  %v3461_v37 = vld [vmem:[#allocation5 + $0x34c] sm:$0xf] }
 0x176   : > { %v2374_v61 = vadd.f32 %v1939_v59, %v438_v38 }
 0x177   : > { %2320 = vmatpush.bf16.msrb.mxu3 %v3249_v56 }
 0x178   : > { %2438 = vst [vmem:[%s4152_s23 + $0x48] sm:$0xff] %v2374_v61 }
 0x179   : > { %v1891_v2 = vpop.f32.mrf.mxu2 }
 0x17a   : > { %v1892_v6 = vadd.f32 %v1891_v2, %v1843_v63  ;;  %v1940_v16 = vpop.f32.mrf.mxu3  ;;  %v1796_v18 = vpop.f32.mrf.mxu0  ;;  %v376_v63 = vld [vmem:[%s3972_s30 + $0xa8] sm:$0xff]  ;;  %v2862_v2 = vld [vmem:[#allocation5 + $0x78] sm:$0xf0] }
 0x17b   : > { %v1845_v22 = vpop.f32.mrf.mxu1  ;;  %v2865_v4 = vor.u32 %v3369_v1, %v2862_v2  ;;  %v3365_v2 = vld [vmem:[#allocation5 + $0x4c] sm:$0xf] }
 0x17c   : > { %v1941_v28 = vadd.f32 %v1940_v16, %v1892_v6  ;;  %v1846_v30 = vadd.f32 %v1845_v22, %v1796_v18  ;;  %v2990_v6 = vld [vmem:[#allocation5 + $0x178] sm:$0xf0]  ;;  %v450_v16 = vadd.f32 %v4230_v29, %v376_v63 }
 0x17d   : > { %1991 = vmatmul.bf16.gmra.mxu0 %v4026_v49  ;;  %2040 = vmatmul.bf16.gmra.mxu1 %v4028_v50  ;;  %v2993_v22 = vor.u32 %v3401_v5, %v2990_v6  ;;  %v3397_v6 = vld [vmem:[#allocation5 + $0x14c] sm:$0xf] }
 0x17e   : > { %v2378_v60 = vadd.f32 %v1941_v28, %v442_v7  ;;  %2089 = vmatmul.bf16.gmra.mxu2 %v4030_v51  ;;  %2173 = vmatpush.bf16.msrb.mxu0 %v2865_v4 }
 0x17f   : > { %2138 = vmatmul.bf16.gmra.mxu3 %v4032_v52  ;;  %2222 = vmatpush.bf16.msrb.mxu1 %v2993_v22 }
 0x180   : > { %2442 = vst [vmem:[%s4152_s23 + $0x68] sm:$0xff] %v2378_v60 }
 0x181   : > { %v1894_v34 = vpop.f32.mrf.mxu2 }
 0x182   : > { %v1895_v38 = vadd.f32 %v1894_v34, %v1846_v30  ;;  %v1943_v55 = vpop.f32.mrf.mxu3  ;;  %v1798_v58 = vpop.f32.mrf.mxu0  ;;  %v3102_v34 = vld [vmem:[#allocation5 + $0x258] sm:$0xf0] }
 0x183   : > { %v1847_v59 = vpop.f32.mrf.mxu1  ;;  %v3105_v36 = vor.u32 %v3429_v33, %v3102_v34  ;;  %v388_v33 = vld [vmem:[%s3972_s30 + $0x108] sm:$0xff] }
 0x184   : > { %v1944_v61 = vadd.f32 %v1943_v55, %v1895_v38  ;;  %v1848_v0 = vadd.f32 %v1847_v59, %v1798_v58  ;;  %v3230_v38 = vld [vmem:[#allocation5 + $0x358] sm:$0xf0]  ;;  %v454_v55 = vadd.f32 %v4230_v29, %v380_v32  ;;  %v3425_v34 = vld [vmem:[#allocation5 + $0x22c] sm:$0xf] }
 0x185   : > { %v3233_v59 = vor.u32 %v3461_v37, %v3230_v38  ;;  %2272 = vmatpush.bf16.msrb.mxu2 %v3105_v36  ;;  %v3457_v38 = vld [vmem:[#allocation5 + $0x32c] sm:$0xf] }
 0x186   : > { %v2382_v62 = vadd.f32 %v1944_v61, %v446_v39 }
 0x187   : > { %2321 = vmatpush.bf16.msrb.mxu3 %v3233_v59 }
 0x188   : > { %2446 = vst [vmem:[%s4152_s23 + $0x88] sm:$0xff] %v2382_v62 }
 0x189   : > { %v1896_v3 = vpop.f32.mrf.mxu2 }
 0x18a   : > { %v1897_v7 = vadd.f32 %v1896_v3, %v1848_v0  ;;  %v1945_v18 = vpop.f32.mrf.mxu3  ;;  %v1801_v19 = vpop.f32.mrf.mxu0  ;;  %v384_v0 = vld [vmem:[%s3972_s30 + $0xe8] sm:$0xff]  ;;  %v2846_v3 = vld [vmem:[#allocation5 + $0x58] sm:$0xf0] }
 0x18b   : > { %v1850_v28 = vpop.f32.mrf.mxu1  ;;  %v2849_v5 = vor.u32 %v3365_v2, %v2846_v3  ;;  %v3361_v3 = vld [vmem:[#allocation5 + $0x2c] sm:$0xf] }
 0x18c   : > { %v1946_v60 = vadd.f32 %v1945_v18, %v1897_v7  ;;  %v1851_v31 = vadd.f32 %v1850_v28, %v1801_v19  ;;  %v2974_v7 = vld [vmem:[#allocation5 + $0x158] sm:$0xf0]  ;;  %v458_v18 = vadd.f32 %v4230_v29, %v384_v0 }
 0x18d   : > { %1996 = vmatmul.bf16.gmra.mxu0 %v4046_v12  ;;  %2045 = vmatmul.bf16.gmra.mxu1 %v4048_v13  ;;  %v2977_v28 = vor.u32 %v3397_v6, %v2974_v7  ;;  %v3393_v7 = vld [vmem:[#allocation5 + $0x12c] sm:$0xf] }
 0x18e   : > { %v2386_v30 = vadd.f32 %v1946_v60, %v450_v16  ;;  %2094 = vmatmul.bf16.gmra.mxu2 %v4050_v14  ;;  %2174 = vmatpush.bf16.msrb.mxu0 %v2849_v5 }
 0x18f   : > { %2143 = vmatmul.bf16.gmra.mxu3 %v4052_v15  ;;  %2223 = vmatpush.bf16.msrb.mxu1 %v2977_v28 }
 0x190   : > { %2450 = vst [vmem:[%s4152_s23 + $0xa8] sm:$0xff] %v2386_v30 }
 0x191   : > { %v1899_v35 = vpop.f32.mrf.mxu2 }
 0x192   : > { %v1900_v39 = vadd.f32 %v1899_v35, %v1851_v31  ;;  %v1948_v58 = vpop.f32.mrf.mxu3  ;;  %v1803_v56 = vpop.f32.mrf.mxu0  ;;  %v3086_v35 = vld [vmem:[#allocation5 + $0x238] sm:$0xf0] }
 0x193   : > { %v1852_v61 = vpop.f32.mrf.mxu1  ;;  %v3089_v37 = vor.u32 %v3425_v34, %v3086_v35  ;;  %v396_v34 = vld [vmem:[%s3972_s30 + $0x148] sm:$0xff] }
 0x194   : > { %v1949_v62 = vadd.f32 %v1948_v58, %v1900_v39  ;;  %v1853_v1 = vadd.f32 %v1852_v61, %v1803_v56  ;;  %v3214_v39 = vld [vmem:[#allocation5 + $0x338] sm:$0xf0]  ;;  %v462_v58 = vadd.f32 %v4230_v29, %v388_v33  ;;  %v3421_v35 = vld [vmem:[#allocation5 + $0x20c] sm:$0xf] }
 0x195   : > { %v3217_v61 = vor.u32 %v3457_v38, %v3214_v39  ;;  %2273 = vmatpush.bf16.msrb.mxu2 %v3089_v37  ;;  %v3453_v39 = vld [vmem:[#allocation5 + $0x30c] sm:$0xf] }
 0x196   : > { %v2390_v63 = vadd.f32 %v1949_v62, %v454_v55 }
 0x197   : > { %2322 = vmatpush.bf16.msrb.mxu3 %v3217_v61 }
 0x198   : > { %2454 = vst [vmem:[%s4152_s23 + $0xc8] sm:$0xff] %v2390_v63 }
 0x199   : > { %v1901_v4 = vpop.f32.mrf.mxu2 }
 0x19a   : > { %v1902_v16 = vadd.f32 %v1901_v4, %v1853_v1  ;;  %v1950_v19 = vpop.f32.mrf.mxu3  ;;  %v1806_v22 = vpop.f32.mrf.mxu0  ;;  %v392_v1 = vld [vmem:[%s3972_s30 + $0x128] sm:$0xff]  ;;  %v2830_v4 = vld [vmem:[#allocation5 + $0x38] sm:$0xf0] }
 0x19b   : > { %v1855_v60 = vpop.f32.mrf.mxu1  ;;  %v2833_v6 = vor.u32 %v3361_v3, %v2830_v4  ;;  %v3357_v4 = vld [vmem:[#allocation5 + $0xc] sm:$0xf] }
 0x19c   : > { %v1951_v30 = vadd.f32 %v1950_v19, %v1902_v16  ;;  %v1856_v32 = vadd.f32 %v1855_v60, %v1806_v22  ;;  %v2958_v16 = vld [vmem:[#allocation5 + $0x138] sm:$0xf0]  ;;  %v466_v19 = vadd.f32 %v4230_v29, %v392_v1 }
 0x19d   : > { %2001 = vmatmul.bf16.gmra.mxu0 %v4066_v40  ;;  %2050 = vmatmul.bf16.gmra.mxu1 %v4068_v41  ;;  %v2961_v60 = vor.u32 %v3393_v7, %v2958_v16  ;;  %v3389_v16 = vld [vmem:[#allocation5 + $0x10c] sm:$0xf] }
 0x19e   : > { %v2394_v31 = vadd.f32 %v1951_v30, %v458_v18  ;;  %2099 = vmatmul.bf16.gmra.mxu2 %v4070_v42  ;;  %2175 = vmatpush.bf16.msrb.mxu0 %v2833_v6 }
 0x19f   : > { %2148 = vmatmul.bf16.gmra.mxu3 %v4072_v43  ;;  %2224 = vmatpush.bf16.msrb.mxu1 %v2961_v60 }
 0x1a0   : > { %2458 = vst [vmem:[%s4152_s23 + $0xe8] sm:$0xff] %v2394_v31 }
 0x1a1   : > { %v1904_v36 = vpop.f32.mrf.mxu2 }
 0x1a2   : > { %v1905_v55 = vadd.f32 %v1904_v36, %v1856_v32  ;;  %v1953_v56 = vpop.f32.mrf.mxu3  ;;  %v1808_v59 = vpop.f32.mrf.mxu0  ;;  %v3070_v36 = vld [vmem:[#allocation5 + $0x218] sm:$0xf0] }
 0x1a3   : > { %v1857_v62 = vpop.f32.mrf.mxu1  ;;  %v3073_v38 = vor.u32 %v3421_v35, %v3070_v36  ;;  %v404_v35 = vld [vmem:[%s3972_s30 + $0x188] sm:$0xff] }
 0x1a4   : > { %v1954_v63 = vadd.f32 %v1953_v56, %v1905_v55  ;;  %v1858_v2 = vadd.f32 %v1857_v62, %v1808_v59  ;;  %v3198_v55 = vld [vmem:[#allocation5 + $0x318] sm:$0xf0]  ;;  %v470_v56 = vadd.f32 %v4230_v29, %v396_v34 }
 0x1a5   : > { %v3201_v62 = vor.u32 %v3453_v39, %v3198_v55  ;;  %2274 = vmatpush.bf16.msrb.mxu2 %v3073_v38  ;;  %v478_v38 = vadd.f32 %v4230_v29, %v404_v35 }
 0x1a6   : > { %v2398_v0 = vadd.f32 %v1954_v63, %v462_v58 }
 0x1a7   : > { %2323 = vmatpush.bf16.msrb.mxu3 %v3201_v62 }
 0x1a8   : > { %2462 = vst [vmem:[%s4152_s23 + $0x108] sm:$0xff] %v2398_v0 }
 0x1a9   : > { %v1906_v5 = vpop.f32.mrf.mxu2 }
 0x1aa   : > { %v1907_v18 = vadd.f32 %v1906_v5, %v1858_v2  ;;  %v1955_v22 = vpop.f32.mrf.mxu3  ;;  %v1811_v28 = vpop.f32.mrf.mxu0  ;;  %v400_v2 = vld [vmem:[%s3972_s30 + $0x168] sm:$0xff]  ;;  %v2814_v5 = vld [vmem:[#allocation5 + $0x18] sm:$0xf0] }
 0x1ab   : > { %v1860_v30 = vpop.f32.mrf.mxu1  ;;  %v2817_v7 = vor.u32 %v3357_v4, %v2814_v5 }
 0x1ac   : > { %v1956_v31 = vadd.f32 %v1955_v22, %v1907_v18  ;;  %v1861_v33 = vadd.f32 %v1860_v30, %v1811_v28  ;;  %v2942_v18 = vld [vmem:[#allocation5 + $0x118] sm:$0xf0]  ;;  %v474_v22 = vadd.f32 %v4230_v29, %v400_v2 }
 0x1ad   : > { %2006 = vmatmul.bf16.gmra.mxu0 %v4086_v8  ;;  %2055 = vmatmul.bf16.gmra.mxu1 %v4088_v9  ;;  %v2945_v30 = vor.u32 %v3389_v16, %v2942_v18  ;;  %v412_v16 = vld [vmem:[%s3972_s30 + $0x1c8] sm:$0xff] }
 0x1ae   : > { %v2402_v32 = vadd.f32 %v1956_v31, %v466_v19  ;;  %2104 = vmatmul.bf16.gmra.mxu2 %v4090_v10  ;;  %2176 = vmatpush.bf16.msrb.mxu0 %v2817_v7 }
 0x1af   : > { %2153 = vmatmul.bf16.gmra.mxu3 %v4092_v11  ;;  %2225 = vmatpush.bf16.msrb.mxu1 %v2945_v30 }
 0x1b0   : > { %2466 = vst [vmem:[%s4152_s23 + $0x128] sm:$0xff] %v2402_v32 }
 0x1b1   : > { %v1909_v37 = vpop.f32.mrf.mxu2 }
 0x1b2   : > { %v1910_v58 = vadd.f32 %v1909_v37, %v1861_v33  ;;  %v1958_v59 = vpop.f32.mrf.mxu3  ;;  %v1813_v61 = vpop.f32.mrf.mxu0 }
 0x1b3   : > { %v1862_v63 = vpop.f32.mrf.mxu1 }
 0x1b4   : > { %v1959_v0 = vadd.f32 %v1958_v59, %v1910_v58  ;;  %v1863_v3 = vadd.f32 %v1862_v63, %v1813_v61  ;;  %v408_v61 = vld [vmem:[%s3972_s30 + $0x1a8] sm:$0xff] }
 0x1b6   : > { %v2406_v1 = vadd.f32 %v1959_v0, %v470_v56 }
 0x1b8   : > { %2470 = vst [vmem:[%s4152_s23 + $0x148] sm:$0xff] %v2406_v1  ;;  %v482_v1 = vadd.f32 %v4230_v29, %v408_v61  ;;  %v4312_v61 = vld [vmem:[#allocation7] sm:$0xf] }
 0x1b9   : > { %v1911_v6 = vpop.f32.mrf.mxu2 }
 0x1ba   : > { %v1912_v19 = vadd.f32 %v1911_v6, %v1863_v3  ;;  %v1960_v28 = vpop.f32.mrf.mxu3  ;;  %v1816_v60 = vpop.f32.mrf.mxu0 }
 0x1bb   : > { %v1865_v31 = vpop.f32.mrf.mxu1 }
 0x1bc   : > { %v1961_v32 = vadd.f32 %v1960_v28, %v1912_v19  ;;  %v1866_v34 = vadd.f32 %v1865_v31, %v1816_v60 }
 0x1bd   : > { %2011 = vmatmul.bf16.gmra.mxu0 %v4106_v44  ;;  %2060 = vmatmul.bf16.gmra.mxu1 %v4108_v45 }
 0x1be   : > { %v2410_v33 = vadd.f32 %v1961_v32, %v474_v22  ;;  %2109 = vmatmul.bf16.gmra.mxu2 %v4110_v46  ;;  %v486_v22 = vadd.f32 %v4230_v29, %v412_v16 }
 0x1bf   : > { %2158 = vmatmul.bf16.gmra.mxu3 %v4112_v47 }
 0x1c0   : > { %2474 = vst [vmem:[%s4152_s23 + $0x168] sm:$0xff] %v2410_v33  ;;  %v416_v33 = vld [vmem:[%s3972_s30 + $0x1e8] sm:$0xff] }
 0x1c1   : > { %v1914_v36 = vpop.f32.mrf.mxu2 }
 0x1c2   : > { %v1915_v37 = vadd.f32 %v1914_v36, %v1866_v34  ;;  %v1963_v39 = vpop.f32.mrf.mxu3  ;;  %v1818_v55 = vpop.f32.mrf.mxu0 }
 0x1c3   : > { %v1867_v58 = vpop.f32.mrf.mxu1 }
 0x1c4   : > { %v1964_v56 = vadd.f32 %v1963_v39, %v1915_v37  ;;  %v1868_v62 = vadd.f32 %v1867_v58, %v1818_v55  ;;  %v490_v37 = vadd.f32 %v4230_v29, %v416_v33  ;;  %v357_v29 = vld [vmem:[%s3972_s30 + $0x10] sm:$0xff] }
 0x1c6   : > { %v2414_v59 = vadd.f32 %v1964_v56, %v478_v38 }
 0x1c8   : > { %2478 = vst [vmem:[%s4152_s23 + $0x188] sm:$0xff] %v2414_v59 }
 0x1c9   : > { %v1916_v63 = vpop.f32.mrf.mxu2 }
 0x1ca   : > { %v1917_v0 = vadd.f32 %v1916_v63, %v1868_v62  ;;  %v1965_v2 = vpop.f32.mrf.mxu3  ;;  %v1821_v3 = vpop.f32.mrf.mxu0  ;;  %v4315_v62 = vperm.slane %v4312_v61, 2 }
 0x1cb   : > { %v1870_v4 = vpop.f32.mrf.mxu1 }
 0x1cc   : > { %v1966_v5 = vadd.f32 %v1965_v2, %v1917_v0  ;;  %v1871_v7 = vadd.f32 %v1870_v4, %v1821_v3 }
 0x1cd   : > { %2016 = vmatmul.bf16.gmra.mxu0 %v4126_v17  ;;  %2065 = vmatmul.bf16.gmra.mxu1 %v4128_v20 }
 0x1ce   : > { %v2418_v6 = vadd.f32 %v1966_v5, %v482_v1  ;;  %2114 = vmatmul.bf16.gmra.mxu2 %v4130_v21  ;;  %v361_v5 = vld [vmem:[%s3972_s30 + $0x30] sm:$0xff] }
 0x1cf   : > { %2163 = vmatmul.bf16.gmra.mxu3 %v4132_v23 }
 0x1d0   : > { %2482 = vst [vmem:[%s4152_s23 + $0x1a8] sm:$0xff] %v2418_v6 }
 0x1d1   : > { %v1919_v18 = vpop.f32.mrf.mxu2 }
 0x1d2   : > { %v1920_v19 = vadd.f32 %v1919_v18, %v1871_v7  ;;  %v1968_v28 = vpop.f32.mrf.mxu3  ;;  %v1823_v60 = vpop.f32.mrf.mxu0 }
 0x1d3   : > { %v1872_v30 = vpop.f32.mrf.mxu1 }
 0x1d4   : > { %v1969_v31 = vadd.f32 %v1968_v28, %v1920_v19  ;;  %v1873_v34 = vadd.f32 %v1872_v30, %v1823_v60  ;;  %v365_v30 = vld [vmem:[%s3972_s30 + $0x50] sm:$0xff] }
 0x1d5   : > { %v439_v33 = vadd.f32 %v4315_v62, %v365_v30 }
 0x1d6   : > { %v2422_v32 = vadd.f32 %v1969_v31, %v486_v22 }
 0x1d8   : > { %2486 = vst [vmem:[%s4152_s23 + $0x1c8] sm:$0xff] %v2422_v32 }
 0x1d9   : > { %v1921_v35 = vpop.f32.mrf.mxu2 }
 0x1da   : > { %v1922_v36 = vadd.f32 %v1921_v35, %v1873_v34  ;;  %v1970_v38 = vpop.f32.mrf.mxu3  ;;  %v1982_v39 = vpop.f32.mrf.mxu0 }
 0x1db   : > { %v2031_v55 = vpop.f32.mrf.mxu1 }
 0x1dc   : > { %v1971_v58 = vadd.f32 %v1970_v38, %v1922_v36  ;;  %v2032_v59 = vadd.f32 %v2031_v55, %v1982_v39  ;;  %v369_v38 = vld [vmem:[%s3972_s30 + $0x70] sm:$0xff] }
 0x1dd   : > { %2177 = vmatmul.bf16.vlgmr.msrb.gmra.mxu0 %v3986_v48  ;;  %2226 = vmatmul.bf16.vlgmr.msrb.gmra.mxu1 %v3988_v53  ;;  %v431_v48 = vadd.f32 %v4315_v62, %v357_v29 }
 0x1de   : > { %v2426_v56 = vadd.f32 %v1971_v58, %v490_v37  ;;  %2275 = vmatmul.bf16.vlgmr.msrb.gmra.mxu2 %v3990_v54 }
 0x1df   : > { %2324 = vmatmul.bf16.vlgmr.msrb.gmra.mxu3 %v3992_v57  ;;  %v435_v57 = vadd.f32 %v4315_v62, %v361_v5 }
 0x1e0   : > { %2490 = vst [vmem:[%s4152_s23 + $0x1e8] sm:$0xff] %v2426_v56 }
 0x1e1   : > { %v2080_v63 = vpop.f32.mrf.mxu2 }
 0x1e2   : > { %v2081_v0 = vadd.f32 %v2080_v63, %v2032_v59  ;;  %v2129_v1 = vpop.f32.mrf.mxu3  ;;  %v1984_v2 = vpop.f32.mrf.mxu0 }
 0x1e3   : > { %v2033_v3 = vpop.f32.mrf.mxu1 }
 0x1e4   : > { %v2130_v53 = vadd.f32 %v2129_v1, %v2081_v0  ;;  %v2034_v54 = vadd.f32 %v2033_v3, %v1984_v2  ;;  %v373_v0 = vld [vmem:[%s3972_s30 + $0x90] sm:$0xff] }
 0x1e5   : > { %v447_v2 = vadd.f32 %v4315_v62, %v373_v0 }
 0x1e6   : > { %v2367_v4 = vadd.f32 %v2130_v53, %v431_v48 }
 0x1e8   : > { %2431 = vst [vmem:[%s4152_s23 + $0x10] sm:$0xff] %v2367_v4 }
 0x1e9   : > { %v2082_v6 = vpop.f32.mrf.mxu2 }
 0x1ea   : > { %v2083_v7 = vadd.f32 %v2082_v6, %v2034_v54  ;;  %v2131_v16 = vpop.f32.mrf.mxu3  ;;  %v1987_v18 = vpop.f32.mrf.mxu0  ;;  %v377_v54 = vld [vmem:[%s3972_s30 + $0xb0] sm:$0xff] }
 0x1eb   : > { %v2036_v19 = vpop.f32.mrf.mxu1 }
 0x1ec   : > { %v2132_v22 = vadd.f32 %v2131_v16, %v2083_v7  ;;  %v2037_v60 = vadd.f32 %v2036_v19, %v1987_v18 }
 0x1ed   : > { %2182 = vmatmul.bf16.gmra.mxu0 %v4006_v24  ;;  %2231 = vmatmul.bf16.gmra.mxu1 %v4008_v25 }
 0x1ee   : > { %v2371_v28 = vadd.f32 %v2132_v22, %v435_v57  ;;  %2280 = vmatmul.bf16.gmra.mxu2 %v4010_v26 }
 0x1ef   : > { %2329 = vmatmul.bf16.gmra.mxu3 %v4012_v27  ;;  %v443_v27 = vadd.f32 %v4315_v62, %v369_v38 }
 0x1f0   : > { %2435 = vst [vmem:[%s4152_s23 + $0x30] sm:$0xff] %v2371_v28  ;;  %v381_v28 = vld [vmem:[%s3972_s30 + $0xd0] sm:$0xff] }
 0x1f1   : > { %v2085_v31 = vpop.f32.mrf.mxu2 }
 0x1f2   : > { %v2086_v32 = vadd.f32 %v2085_v31, %v2037_v60  ;;  %v2134_v34 = vpop.f32.mrf.mxu3  ;;  %v1989_v35 = vpop.f32.mrf.mxu0  ;;  %v455_v31 = vadd.f32 %v4315_v62, %v381_v28 }
 0x1f3   : > { %v2038_v36 = vpop.f32.mrf.mxu1 }
 0x1f4   : > { %v2135_v24 = vadd.f32 %v2134_v34, %v2086_v32  ;;  %v2039_v25 = vadd.f32 %v2038_v36, %v1989_v35  ;;  %v385_v36 = vld [vmem:[%s3972_s30 + $0xf0] sm:$0xff] }
 0x1f6   : > { %v2375_v37 = vadd.f32 %v2135_v24, %v439_v33 }
 0x1f8   : > { %2439 = vst [vmem:[%s4152_s23 + $0x50] sm:$0xff] %v2375_v37 }
 0x1f9   : > { %v2087_v39 = vpop.f32.mrf.mxu2 }
 0x1fa   : > { %v2088_v26 = vadd.f32 %v2087_v39, %v2039_v25  ;;  %v2136_v55 = vpop.f32.mrf.mxu3  ;;  %v1992_v58 = vpop.f32.mrf.mxu0 }
 0x1fb   : > { %v2041_v56 = vpop.f32.mrf.mxu1 }
 0x1fc   : > { %v2137_v59 = vadd.f32 %v2136_v55, %v2088_v26  ;;  %v2042_v63 = vadd.f32 %v2041_v56, %v1992_v58  ;;  %v389_v55 = vld [vmem:[%s3972_s30 + $0x110] sm:$0xff] }
 0x1fd   : > { %2187 = vmatmul.bf16.gmra.mxu0 %v4026_v49  ;;  %2236 = vmatmul.bf16.gmra.mxu1 %v4028_v50 }
 0x1fe   : > { %v2379_v29 = vadd.f32 %v2137_v59, %v443_v27  ;;  %2285 = vmatmul.bf16.gmra.mxu2 %v4030_v51  ;;  %v463_v59 = vadd.f32 %v4315_v62, %v389_v55 }
 0x1ff   : > { %2334 = vmatmul.bf16.gmra.mxu3 %v4032_v52  ;;  %v451_v52 = vadd.f32 %v4315_v62, %v377_v54 }
 0x200   : > { %2443 = vst [vmem:[%s4152_s23 + $0x70] sm:$0xff] %v2379_v29 }
 0x201   : > { %v2090_v48 = vpop.f32.mrf.mxu2 }
 0x202   : > { %v2091_v1 = vadd.f32 %v2090_v48, %v2042_v63  ;;  %v2139_v3 = vpop.f32.mrf.mxu3  ;;  %v1994_v53 = vpop.f32.mrf.mxu0 }
 0x203   : > { %v2043_v4 = vpop.f32.mrf.mxu1 }
 0x204   : > { %v2140_v49 = vadd.f32 %v2139_v3, %v2091_v1  ;;  %v2044_v50 = vadd.f32 %v2043_v4, %v1994_v53  ;;  %v393_v1 = vld [vmem:[%s3972_s30 + $0x130] sm:$0xff] }
 0x206   : > { %v2383_v5 = vadd.f32 %v2140_v49, %v447_v2 }
 0x208   : > { %2447 = vst [vmem:[%s4152_s23 + $0x90] sm:$0xff] %v2383_v5 }
 0x209   : > { %v2092_v6 = vpop.f32.mrf.mxu2 }
 0x20a   : > { %v2093_v51 = vadd.f32 %v2092_v6, %v2044_v50  ;;  %v2141_v7 = vpop.f32.mrf.mxu3  ;;  %v1997_v57 = vpop.f32.mrf.mxu0  ;;  %v397_v50 = vld [vmem:[%s3972_s30 + $0x150] sm:$0xff] }
 0x20b   : > { %v2046_v16 = vpop.f32.mrf.mxu1 }
 0x20c   : > { %v2142_v18 = vadd.f32 %v2141_v7, %v2093_v51  ;;  %v2047_v22 = vadd.f32 %v2046_v16, %v1997_v57 }
 0x20d   : > { %2192 = vmatmul.bf16.gmra.mxu0 %v4046_v12  ;;  %2241 = vmatmul.bf16.gmra.mxu1 %v4048_v13 }
 0x20e   : > { %v2387_v19 = vadd.f32 %v2142_v18, %v451_v52  ;;  %2290 = vmatmul.bf16.gmra.mxu2 %v4050_v14  ;;  %v471_v52 = vadd.f32 %v4315_v62, %v397_v50 }
 0x20f   : > { %2339 = vmatmul.bf16.gmra.mxu3 %v4052_v15  ;;  %v459_v15 = vadd.f32 %v4315_v62, %v385_v36 }
 0x210   : > { %2451 = vst [vmem:[%s4152_s23 + $0xb0] sm:$0xff] %v2387_v19  ;;  %v401_v19 = vld [vmem:[%s3972_s30 + $0x170] sm:$0xff] }
 0x211   : > { %v2095_v60 = vpop.f32.mrf.mxu2 }
 0x212   : > { %v2096_v30 = vadd.f32 %v2095_v60, %v2047_v22  ;;  %v2144_v32 = vpop.f32.mrf.mxu3  ;;  %v1999_v33 = vpop.f32.mrf.mxu0 }
 0x213   : > { %v2048_v34 = vpop.f32.mrf.mxu1 }
 0x214   : > { %v2145_v12 = vadd.f32 %v2144_v32, %v2096_v30  ;;  %v2049_v13 = vadd.f32 %v2048_v34, %v1999_v33  ;;  %v405_v34 = vld [vmem:[%s3972_s30 + $0x190] sm:$0xff] }
 0x215   : > { %v479_v36 = vadd.f32 %v4315_v62, %v405_v34 }
 0x216   : > { %v2391_v35 = vadd.f32 %v2145_v12, %v455_v31 }
 0x218   : > { %2455 = vst [vmem:[%s4152_s23 + $0xd0] sm:$0xff] %v2391_v35 }
 0x219   : > { %v2097_v24 = vpop.f32.mrf.mxu2 }
 0x21a   : > { %v2098_v14 = vadd.f32 %v2097_v24, %v2049_v13  ;;  %v2146_v37 = vpop.f32.mrf.mxu3  ;;  %v2002_v38 = vpop.f32.mrf.mxu0 }
 0x21b   : > { %v2051_v25 = vpop.f32.mrf.mxu1 }
 0x21c   : > { %v2147_v39 = vadd.f32 %v2146_v37, %v2098_v14  ;;  %v2052_v27 = vadd.f32 %v2051_v25, %v2002_v38  ;;  %v409_v37 = vld [vmem:[%s3972_s30 + $0x1b0] sm:$0xff] }
 0x21d   : > { %2197 = vmatmul.bf16.gmra.mxu0 %v4066_v40  ;;  %2246 = vmatmul.bf16.gmra.mxu1 %v4068_v41 }
 0x21e   : > { %v2395_v26 = vadd.f32 %v2147_v39, %v459_v15  ;;  %2295 = vmatmul.bf16.gmra.mxu2 %v4070_v42 }
 0x21f   : > { %2344 = vmatmul.bf16.gmra.mxu3 %v4072_v43  ;;  %v467_v43 = vadd.f32 %v4315_v62, %v393_v1 }
 0x220   : > { %2459 = vst [vmem:[%s4152_s23 + $0xf0] sm:$0xff] %v2395_v26 }
 0x221   : > { %v2100_v58 = vpop.f32.mrf.mxu2 }
 0x222   : > { %v2101_v56 = vadd.f32 %v2100_v58, %v2052_v27  ;;  %v2149_v29 = vpop.f32.mrf.mxu3  ;;  %v2004_v63 = vpop.f32.mrf.mxu0 }
 0x223   : > { %v2053_v0 = vpop.f32.mrf.mxu1 }
 0x224   : > { %v2150_v40 = vadd.f32 %v2149_v29, %v2101_v56  ;;  %v2054_v41 = vadd.f32 %v2053_v0, %v2004_v63  ;;  %v413_v56 = vld [vmem:[%s3972_s30 + $0x1d0] sm:$0xff] }
 0x225   : > { %v487_v63 = vadd.f32 %v4315_v62, %v413_v56 }
 0x226   : > { %v2399_v48 = vadd.f32 %v2150_v40, %v463_v59 }
 0x228   : > { %2463 = vst [vmem:[%s4152_s23 + $0x110] sm:$0xff] %v2399_v48 }
 0x229   : > { %v2102_v2 = vpop.f32.mrf.mxu2 }
 0x22a   : > { %v2103_v42 = vadd.f32 %v2102_v2, %v2054_v41  ;;  %v2151_v3 = vpop.f32.mrf.mxu3  ;;  %v2007_v53 = vpop.f32.mrf.mxu0  ;;  %v417_v41 = vld [vmem:[%s3972_s30 + $0x1f0] sm:$0xff] }
 0x22b   : > { %v2056_v4 = vpop.f32.mrf.mxu1 }
 0x22c   : > { %v2152_v49 = vadd.f32 %v2151_v3, %v2103_v42  ;;  %v2057_v54 = vadd.f32 %v2056_v4, %v2007_v53 }
 0x22d   : > { %2202 = vmatmul.bf16.gmra.mxu0 %v4086_v8  ;;  %2251 = vmatmul.bf16.gmra.mxu1 %v4088_v9 }
 0x22e   : > { %v2403_v5 = vadd.f32 %v2152_v49, %v467_v43  ;;  %2300 = vmatmul.bf16.gmra.mxu2 %v4090_v10 }
 0x22f   : > { %2349 = vmatmul.bf16.gmra.mxu3 %v4092_v11  ;;  %v475_v11 = vadd.f32 %v4315_v62, %v401_v19 }
 0x230   : > { %2467 = vst [vmem:[%s4152_s23 + $0x130] sm:$0xff] %v2403_v5  ;;  %v4395_v5 = vperm.slane %v4312_v61, 3 }
 0x231   : > { %v2105_v6 = vpop.f32.mrf.mxu2 }
 0x232   : > { %v2106_v51 = vadd.f32 %v2105_v6, %v2057_v54  ;;  %v2154_v7 = vpop.f32.mrf.mxu3  ;;  %v2009_v57 = vpop.f32.mrf.mxu0  ;;  %v358_v54 = vld [vmem:[%s3972_s30 + $0x18] sm:$0xff] }
 0x233   : > { %v2058_v16 = vpop.f32.mrf.mxu1 }
 0x234   : > { %v2155_v8 = vadd.f32 %v2154_v7, %v2106_v51  ;;  %v2059_v9 = vadd.f32 %v2058_v16, %v2009_v57  ;;  %v432_v51 = vadd.f32 %v4395_v5, %v358_v54 }
 0x236   : > { %v2407_v18 = vadd.f32 %v2155_v8, %v471_v52  ;;  %v362_v8 = vld [vmem:[%s3972_s30 + $0x38] sm:$0xff] }
 0x237   : > { %v436_v61 = vadd.f32 %v4395_v5, %v362_v8 }
 0x238   : > { %2471 = vst [vmem:[%s4152_s23 + $0x150] sm:$0xff] %v2407_v18 }
 0x239   : > { %v2107_v22 = vpop.f32.mrf.mxu2 }
 0x23a   : > { %v2108_v10 = vadd.f32 %v2107_v22, %v2059_v9  ;;  %v2156_v28 = vpop.f32.mrf.mxu3  ;;  %v2012_v60 = vpop.f32.mrf.mxu0 }
 0x23b   : > { %v2061_v30 = vpop.f32.mrf.mxu1 }
 0x23c   : > { %v2157_v31 = vadd.f32 %v2156_v28, %v2108_v10  ;;  %v2062_v33 = vadd.f32 %v2061_v30, %v2012_v60 }
 0x23d   : > { %2207 = vmatmul.bf16.gmra.mxu0 %v4106_v44  ;;  %2256 = vmatmul.bf16.gmra.mxu1 %v4108_v45 }
 0x23e   : > { %v2411_v32 = vadd.f32 %v2157_v31, %v475_v11  ;;  %2305 = vmatmul.bf16.gmra.mxu2 %v4110_v46  ;;  %v366_v31 = vld [vmem:[%s3972_s30 + $0x58] sm:$0xff] }
 0x23f   : > { %2354 = vmatmul.bf16.gmra.mxu3 %v4112_v47  ;;  %v483_v47 = vadd.f32 %v4315_v62, %v409_v37  ;;  %v440_v34 = vadd.f32 %v4395_v5, %v366_v31 }
 0x240   : > { %2475 = vst [vmem:[%s4152_s23 + $0x170] sm:$0xff] %v2411_v32 }
 0x241   : > { %v2110_v12 = vpop.f32.mrf.mxu2 }
 0x242   : > { %v2111_v35 = vadd.f32 %v2110_v12, %v2062_v33  ;;  %v2159_v13 = vpop.f32.mrf.mxu3  ;;  %v2014_v24 = vpop.f32.mrf.mxu0 }
 0x243   : > { %v2063_v14 = vpop.f32.mrf.mxu1 }
 0x244   : > { %v2160_v44 = vadd.f32 %v2159_v13, %v2111_v35  ;;  %v2064_v45 = vadd.f32 %v2063_v14, %v2014_v24  ;;  %v370_v14 = vld [vmem:[%s3972_s30 + $0x78] sm:$0xff] }
 0x246   : > { %v2415_v15 = vadd.f32 %v2160_v44, %v479_v36 }
 0x248   : > { %2479 = vst [vmem:[%s4152_s23 + $0x190] sm:$0xff] %v2415_v15 }
 0x249   : > { %v2112_v38 = vpop.f32.mrf.mxu2 }
 0x24a   : > { %v2113_v46 = vadd.f32 %v2112_v38, %v2064_v45  ;;  %v2161_v25 = vpop.f32.mrf.mxu3  ;;  %v2017_v39 = vpop.f32.mrf.mxu0  ;;  %v444_v45 = vadd.f32 %v4395_v5, %v370_v14 }
 0x24b   : > { %v2066_v26 = vpop.f32.mrf.mxu1 }
 0x24c   : > { %v2162_v27 = vadd.f32 %v2161_v25, %v2113_v46  ;;  %v2067_v58 = vadd.f32 %v2066_v26, %v2017_v39 }
 0x24d   : > { %2212 = vmatmul.bf16.gmra.mxu0 %v4126_v17  ;;  %2261 = vmatmul.bf16.gmra.mxu1 %v4128_v20 }
 0x24e   : > { %v2419_v55 = vadd.f32 %v2162_v27, %v483_v47  ;;  %2310 = vmatmul.bf16.gmra.mxu2 %v4130_v21  ;;  %v374_v27 = vld [vmem:[%s3972_s30 + $0x98] sm:$0xff] }
 0x24f   : > { %2359 = vmatmul.bf16.gmra.mxu3 %v4132_v23  ;;  %v491_v23 = vadd.f32 %v4315_v62, %v417_v41  ;;  %v448_v56 = vadd.f32 %v4395_v5, %v374_v27 }
 0x250   : > { %2483 = vst [vmem:[%s4152_s23 + $0x1b0] sm:$0xff] %v2419_v55 }
 0x251   : > { %v2115_v59 = vpop.f32.mrf.mxu2 }
 0x252   : > { %v2116_v29 = vadd.f32 %v2115_v59, %v2067_v58  ;;  %v2164_v0 = vpop.f32.mrf.mxu3  ;;  %v2019_v40 = vpop.f32.mrf.mxu0 }
 0x253   : > { %v2068_v48 = vpop.f32.mrf.mxu1 }
 0x254   : > { %v2165_v17 = vadd.f32 %v2164_v0, %v2116_v29  ;;  %v2069_v20 = vadd.f32 %v2068_v48, %v2019_v40  ;;  %v378_v48 = vld [vmem:[%s3972_s30 + $0xb8] sm:$0xff] }
 0x256   : > { %v2423_v1 = vadd.f32 %v2165_v17, %v487_v63 }
 0x258   : > { %2487 = vst [vmem:[%s4152_s23 + $0x1d0] sm:$0xff] %v2423_v1 }
 0x259   : > { %v2117_v2 = vpop.f32.mrf.mxu2 }
 0x25a   : > { %v2118_v21 = vadd.f32 %v2117_v2, %v2069_v20  ;;  %v2166_v42 = vpop.f32.mrf.mxu3  ;;  %v2178_v43 = vpop.f32.mrf.mxu0  ;;  %v452_v20 = vadd.f32 %v4395_v5, %v378_v48 }
 0x25b   : > { %v2227_v3 = vpop.f32.mrf.mxu1 }
 0x25c   : > { %v2167_v53 = vadd.f32 %v2166_v42, %v2118_v21  ;;  %v2228_v49 = vadd.f32 %v2227_v3, %v2178_v43 }
 0x25e   : > { %v2427_v4 = vadd.f32 %v2167_v53, %v491_v23  ;;  %v382_v53 = vld [vmem:[%s3972_s30 + $0xd8] sm:$0xff] }
 0x25f   : > { %v456_v54 = vadd.f32 %v4395_v5, %v382_v53 }
 0x260   : > { %2491 = vst [vmem:[%s4152_s23 + $0x1f0] sm:$0xff] %v2427_v4 }
 0x261   : > { %v2276_v50 = vpop.f32.mrf.mxu2 }
 0x262   : > { %v2277_v6 = vadd.f32 %v2276_v50, %v2228_v49  ;;  %v2325_v52 = vpop.f32.mrf.mxu3  ;;  %v2180_v7 = vpop.f32.mrf.mxu0 }
 0x263   : > { %v2229_v62 = vpop.f32.mrf.mxu1 }
 0x264   : > { %v2326_v57 = vadd.f32 %v2325_v52, %v2277_v6  ;;  %v2230_v18 = vadd.f32 %v2229_v62, %v2180_v7  ;;  %v386_v62 = vld [vmem:[%s3972_s30 + $0xf8] sm:$0xff] }
 0x266   : > { %v2368_v16 = vadd.f32 %v2326_v57, %v432_v51 }
 0x268   : > { %2432 = vst [vmem:[%s4152_s23 + $0x18] sm:$0xff] %v2368_v16 }
 0x269   : > { %v2278_v19 = vpop.f32.mrf.mxu2 }
 0x26a   : > { %v2279_v9 = vadd.f32 %v2278_v19, %v2230_v18  ;;  %v2327_v22 = vpop.f32.mrf.mxu3  ;;  %v2183_v10 = vpop.f32.mrf.mxu0  ;;  %v460_v18 = vadd.f32 %v4395_v5, %v386_v62 }
 0x26b   : > { %v2232_v11 = vpop.f32.mrf.mxu1 }
 0x26c   : > { %v2328_v28 = vadd.f32 %v2327_v22, %v2279_v9  ;;  %v2233_v30 = vadd.f32 %v2232_v11, %v2183_v10 }
 0x26e   : > { %v2372_v60 = vadd.f32 %v2328_v28, %v436_v61  ;;  %v390_v28 = vld [vmem:[%s3972_s30 + $0x118] sm:$0xff] }
 0x26f   : > { %v464_v31 = vadd.f32 %v4395_v5, %v390_v28 }
 0x270   : > { %2436 = vst [vmem:[%s4152_s23 + $0x38] sm:$0xff] %v2372_v60 }
 0x271   : > { %v2281_v32 = vpop.f32.mrf.mxu2 }
 0x272   : > { %v2282_v33 = vadd.f32 %v2281_v32, %v2233_v30  ;;  %v2330_v12 = vpop.f32.mrf.mxu3  ;;  %v2185_v35 = vpop.f32.mrf.mxu0 }
 0x273   : > { %v2234_v36 = vpop.f32.mrf.mxu1 }
 0x274   : > { %v2331_v13 = vadd.f32 %v2330_v12, %v2282_v33  ;;  %v2235_v44 = vadd.f32 %v2234_v36, %v2185_v35  ;;  %v394_v36 = vld [vmem:[%s3972_s30 + $0x138] sm:$0xff] }
 0x276   : > { %v2376_v24 = vadd.f32 %v2331_v13, %v440_v34 }
 0x278   : > { %2440 = vst [vmem:[%s4152_s23 + $0x58] sm:$0xff] %v2376_v24 }
 0x279   : > { %v2283_v15 = vpop.f32.mrf.mxu2 }
 0x27a   : > { %v2284_v37 = vadd.f32 %v2283_v15, %v2235_v44  ;;  %v2332_v38 = vpop.f32.mrf.mxu3  ;;  %v2188_v46 = vpop.f32.mrf.mxu0  ;;  %v468_v44 = vadd.f32 %v4395_v5, %v394_v36 }
 0x27b   : > { %v2237_v47 = vpop.f32.mrf.mxu1 }
 0x27c   : > { %v2333_v25 = vadd.f32 %v2332_v38, %v2284_v37  ;;  %v2238_v26 = vadd.f32 %v2237_v47, %v2188_v46 }
 0x27e   : > { %v2380_v39 = vadd.f32 %v2333_v25, %v444_v45  ;;  %v398_v25 = vld [vmem:[%s3972_s30 + $0x158] sm:$0xff] }
 0x27f   : > { %v472_v27 = vadd.f32 %v4395_v5, %v398_v25 }
 0x280   : > { %2444 = vst [vmem:[%s4152_s23 + $0x78] sm:$0xff] %v2380_v39 }
 0x281   : > { %v2286_v55 = vpop.f32.mrf.mxu2 }
 0x282   : > { %v2287_v58 = vadd.f32 %v2286_v55, %v2238_v26  ;;  %v2335_v59 = vpop.f32.mrf.mxu3  ;;  %v2190_v29 = vpop.f32.mrf.mxu0 }
 0x283   : > { %v2239_v63 = vpop.f32.mrf.mxu1 }
 0x284   : > { %v2336_v0 = vadd.f32 %v2335_v59, %v2287_v58  ;;  %v2240_v17 = vadd.f32 %v2239_v63, %v2190_v29  ;;  %v402_v63 = vld [vmem:[%s3972_s30 + $0x178] sm:$0xff] }
 0x286   : > { %v2384_v40 = vadd.f32 %v2336_v0, %v448_v56 }
 0x288   : > { %2448 = vst [vmem:[%s4152_s23 + $0x98] sm:$0xff] %v2384_v40 }
 0x289   : > { %v2288_v1 = vpop.f32.mrf.mxu2 }
 0x28a   : > { %v2289_v41 = vadd.f32 %v2288_v1, %v2240_v17  ;;  %v2337_v2 = vpop.f32.mrf.mxu3  ;;  %v2193_v21 = vpop.f32.mrf.mxu0  ;;  %v476_v17 = vadd.f32 %v4395_v5, %v402_v63 }
 0x28b   : > { %v2242_v23 = vpop.f32.mrf.mxu1 }
 0x28c   : > { %v2338_v42 = vadd.f32 %v2337_v2, %v2289_v41  ;;  %v2243_v3 = vadd.f32 %v2242_v23, %v2193_v21 }
 0x28e   : > { %v2388_v43 = vadd.f32 %v2338_v42, %v452_v20  ;;  %v406_v42 = vld [vmem:[%s3972_s30 + $0x198] sm:$0xff] }
 0x28f   : > { %v480_v53 = vadd.f32 %v4395_v5, %v406_v42 }
 0x290   : > { %2452 = vst [vmem:[%s4152_s23 + $0xb8] sm:$0xff] %v2388_v43 }
 0x291   : > { %v2291_v4 = vpop.f32.mrf.mxu2 }
 0x292   : > { %v2292_v49 = vadd.f32 %v2291_v4, %v2243_v3  ;;  %v2340_v50 = vpop.f32.mrf.mxu3  ;;  %v2195_v6 = vpop.f32.mrf.mxu0 }
 0x293   : > { %v2244_v51 = vpop.f32.mrf.mxu1 }
 0x294   : > { %v2341_v52 = vadd.f32 %v2340_v50, %v2292_v49  ;;  %v2245_v57 = vadd.f32 %v2244_v51, %v2195_v6  ;;  %v410_v51 = vld [vmem:[%s3972_s30 + $0x1b8] sm:$0xff] }
 0x296   : > { %v2392_v7 = vadd.f32 %v2341_v52, %v456_v54 }
 0x298   : > { %2456 = vst [vmem:[%s4152_s23 + $0xd8] sm:$0xff] %v2392_v7 }
 0x299   : > { %v2293_v16 = vpop.f32.mrf.mxu2 }
 0x29a   : > { %v2294_v8 = vadd.f32 %v2293_v16, %v2245_v57  ;;  %v2342_v19 = vpop.f32.mrf.mxu3  ;;  %v2198_v9 = vpop.f32.mrf.mxu0  ;;  %v484_v57 = vadd.f32 %v4395_v5, %v410_v51 }
 0x29b   : > { %v2247_v61 = vpop.f32.mrf.mxu1 }
 0x29c   : > { %v2343_v22 = vadd.f32 %v2342_v19, %v2294_v8  ;;  %v2248_v11 = vadd.f32 %v2247_v61, %v2198_v9 }
 0x29e   : > { %v2396_v10 = vadd.f32 %v2343_v22, %v460_v18  ;;  %v414_v22 = vld [vmem:[%s3972_s30 + $0x1d8] sm:$0xff] }
 0x29f   : > { %v488_v28 = vadd.f32 %v4395_v5, %v414_v22 }
 0x2a0   : > { %2460 = vst [vmem:[%s4152_s23 + $0xf8] sm:$0xff] %v2396_v10 }
 0x2a1   : > { %v2296_v60 = vpop.f32.mrf.mxu2 }
 0x2a2   : > { %v2297_v30 = vadd.f32 %v2296_v60, %v2248_v11  ;;  %v2345_v32 = vpop.f32.mrf.mxu3  ;;  %v2200_v33 = vpop.f32.mrf.mxu0 }
 0x2a3   : > { %v2249_v34 = vpop.f32.mrf.mxu1 }
 0x2a4   : > { %v2346_v12 = vadd.f32 %v2345_v32, %v2297_v30  ;;  %v2250_v13 = vadd.f32 %v2249_v34, %v2200_v33  ;;  %v418_v34 = vld [vmem:[%s3972_s30 + $0x1f8] sm:$0xff] }
 0x2a6   : > { %v2400_v35 = vadd.f32 %v2346_v12, %v464_v31 }
 0x2a8   : > { %2464 = vst [vmem:[%s4152_s23 + $0x118] sm:$0xff] %v2400_v35 }
 0x2a9   : > { %v2298_v24 = vpop.f32.mrf.mxu2 }
 0x2aa   : > { %v2299_v14 = vadd.f32 %v2298_v24, %v2250_v13  ;;  %v2347_v15 = vpop.f32.mrf.mxu3  ;;  %v2203_v37 = vpop.f32.mrf.mxu0  ;;  %v492_v13 = vadd.f32 %v4395_v5, %v418_v34 }
 0x2ab   : > { %v2252_v45 = vpop.f32.mrf.mxu1 }
 0x2ac   : > { %v2348_v38 = vadd.f32 %v2347_v15, %v2299_v14  ;;  %v2253_v47 = vadd.f32 %v2252_v45, %v2203_v37 }
 0x2ae   : > { %v2404_v46 = vadd.f32 %v2348_v38, %v468_v44 }
 0x2b0   : > { %2468 = vst [vmem:[%s4152_s23 + $0x138] sm:$0xff] %v2404_v46 }
 0x2b1   : > { %v2301_v39 = vpop.f32.mrf.mxu2 }
 0x2b2   : > { %v2302_v26 = vadd.f32 %v2301_v39, %v2253_v47  ;;  %v2350_v55 = vpop.f32.mrf.mxu3  ;;  %v2205_v58 = vpop.f32.mrf.mxu0 }
 0x2b3   : > { %v2254_v56 = vpop.f32.mrf.mxu1 }
 0x2b4   : > { %v2351_v59 = vadd.f32 %v2350_v55, %v2302_v26  ;;  %v2255_v0 = vadd.f32 %v2254_v56, %v2205_v58 }
 0x2b6   : > { %v2408_v29 = vadd.f32 %v2351_v59, %v472_v27 }
 0x2b8   : > { %2472 = vst [vmem:[%s4152_s23 + $0x158] sm:$0xff] %v2408_v29 }
 0x2b9   : > { %v2303_v40 = vpop.f32.mrf.mxu2 }
 0x2ba   : > { %v2304_v48 = vadd.f32 %v2303_v40, %v2255_v0  ;;  %v2352_v1 = vpop.f32.mrf.mxu3  ;;  %v2208_v41 = vpop.f32.mrf.mxu0 }
 0x2bb   : > { %v2257_v20 = vpop.f32.mrf.mxu1 }
 0x2bc   : > { %v2353_v2 = vadd.f32 %v2352_v1, %v2304_v48  ;;  %v2258_v23 = vadd.f32 %v2257_v20, %v2208_v41 }
 0x2be   : > { %v2412_v21 = vadd.f32 %v2353_v2, %v476_v17 }
 0x2c0   : > { %2476 = vst [vmem:[%s4152_s23 + $0x178] sm:$0xff] %v2412_v21 }
 0x2c1   : > { %v2306_v43 = vpop.f32.mrf.mxu2 }
 0x2c2   : > { %v2307_v3 = vadd.f32 %v2306_v43, %v2258_v23  ;;  %v2355_v4 = vpop.f32.mrf.mxu3  ;;  %v2210_v49 = vpop.f32.mrf.mxu0 }
 0x2c3   : > { %v2259_v54 = vpop.f32.mrf.mxu1 }
 0x2c4   : > { %v2356_v50 = vadd.f32 %v2355_v4, %v2307_v3  ;;  %v2260_v52 = vadd.f32 %v2259_v54, %v2210_v49 }
 0x2c6   : > { %v2416_v6 = vadd.f32 %v2356_v50, %v480_v53 }
 0x2c8   : > { %2480 = vst [vmem:[%s4152_s23 + $0x198] sm:$0xff] %v2416_v6 }
 0x2c9   : > { %v2308_v7 = vpop.f32.mrf.mxu2 }
 0x2ca   : > { %v2309_v62 = vadd.f32 %v2308_v7, %v2260_v52  ;;  %v2357_v16 = vpop.f32.mrf.mxu3  ;;  %v2213_v8 = vpop.f32.mrf.mxu0 }
 0x2cb   : > { %v2262_v18 = vpop.f32.mrf.mxu1 }
 0x2cc   : > { %v2358_v19 = vadd.f32 %v2357_v16, %v2309_v62  ;;  %v2263_v61 = vadd.f32 %v2262_v18, %v2213_v8 }
 0x2ce   : > { %v2420_v9 = vadd.f32 %v2358_v19, %v484_v57 }
 0x2d0   : > { %2484 = vst [vmem:[%s4152_s23 + $0x1b8] sm:$0xff] %v2420_v9 }
 0x2d1   : > { %v2311_v10 = vpop.f32.mrf.mxu2 }
 0x2d2   : > { %v2312_v11 = vadd.f32 %v2311_v10, %v2263_v61  ;;  %v2360_v60 = vpop.f32.mrf.mxu3  ;;  %v2215_v31 = vpop.f32.mrf.mxu0 }
 0x2d3   : > { %v2264_v32 = vpop.f32.mrf.mxu1 }
 0x2d4   : > { %v2361_v30 = vadd.f32 %v2360_v60, %v2312_v11  ;;  %v2265_v12 = vadd.f32 %v2264_v32, %v2215_v31 }
 0x2d6   : > { %v2424_v33 = vadd.f32 %v2361_v30, %v488_v28 }
 0x2d8   : > { %2488 = vst [vmem:[%s4152_s23 + $0x1d8] sm:$0xff] %v2424_v33 }
 0x2d9   : > { %v2313_v35 = vpop.f32.mrf.mxu2 }
 0x2da   : > { %v2314_v36 = vadd.f32 %v2313_v35, %v2265_v12  ;;  %v2362_v24 = vpop.f32.mrf.mxu3 }
 0x2dc   : > { %v2363_v14 = vadd.f32 %v2362_v24, %v2314_v36 }
 0x2de   : > { %v2428_v44 = vadd.f32 %v2363_v14, %v492_v13 }
 0x2e0   : > { %2492 = vst [vmem:[%s4152_s23 + $0x1f8] sm:$0xff] %v2428_v44 }
 0x2e1   : > { %3728 = shalt.err (!%p3725_p0)
}
 0x2e2   : > { %s3799_s1 = smov 512   ;;  %s3800_s10 = smov 32  }
 0x2e3   : > { %3498 = dma.vmem_to_hbm [thread:$0]  (%p3912_p7), %s2510_s7, 8192, %s2512_s28, %s2494_s18, %s3799_s1, %s3799_s1, %s3800_s10  }
 0x2e4 PF: > { %s2526_s12 = sand.u32 1, %s3771_s15   ;;  %p3515_p3 = pnand %p2659_p11, %p3875_p6 }
 0x2e5   : > { %s2527_s21 = scalar_lea.sflag [#allocation4], %s2526_s12 }
 0x2e6   : > { %p3516_p5 = pneg %p3515_p3 }
 0x2e8   : > { %3766 = dma.done.wait (%p3516_p5), %s2527_s21, 8192  }
 0x2e9   : > { %3768 = vsyncadd (%p3516_p5), %s2527_s21, 4294959104  ;;  %s24_s20 = sadd.s32 1, %s3791_s20   ;;  %s4511_s0 = sld [smem:[#allocation16_spill]] }
 0x2ea   : > { %p21_p9 = scmp.ge.s32.totalorder %s24_s20, 4   ;;  %s4512_s27 = sld [smem:[#allocation15_spill]] }
 0x2eb   : > { %s4513_s15 = smov %s3775_s16  ;;  %s4514_s16 = smov %s3779_s17 }
 0x2ec   : > { %s4516_s18 = smov %s3787_s19  ;;  %23 = sbr.rel (!%p21_p9) target bundleno = 13 (0xd), region = 108 }
 0x2ef   : > { %s4515_s17 = smov %s4511_s0 }
 0x2f0   : > { %s4517_s19 = smov %s4512_s27 }
 0x2f1   :  { %2533 = vsyncpa [#allocation3], 1 }
 0x2f2   :  { %2535 = vsyncpa [#allocation3 + $0x1], 1 }
 0x2f3   :  { %2536 = vsyncpa [#allocation6], 1 }
 0x2f4   :  { %2537 = vsyncpa [#allocation9], 1 }
 0x2f5   :  { %2539 = vsyncpa [#allocation9 + $0x1], 1 }
 0x2f6   :  { %2540 = vsyncpa [#allocation4], 1 }
 0x2f7   :  { %2542 = vsyncpa [#allocation4 + $0x1], 1 }

</bundles_post_ra>
